<compile_context>
chip_gen: v7x
topology: tpu7x:2x2x1
jax: 0.10.0
libtpu: 0.0.40
codegen_flags: <defaults>
</compile_context>

<pallas_src>
import functools

import jax
import jax.numpy as jnp
from jax.experimental import pallas as pl
from jax.experimental.pallas import tpu as pltpu


def _round_up(v, m):
    return (v + m - 1) // m * m


def _gru_chunk_kernel(x_ref, h0_ref, wih_ref, bih_ref, whh_ref, bhhn_ref,
                      out_ref, gi_scr, h_scr, *, tsteps, hp):
    """One grid step == `tsteps` timesteps of the GRU recurrence.

    x_ref   : (T*Bp, C)   x.dtype  time-major rows (row = t*Bp + b)
    h0_ref  : (Bp, Hp)    f32      initial hidden state (padded)
    wih_ref : (C, 3*Hp)   cd       padded W_ih^T, gate-aligned column tiles
    bih_ref : (1, 3*Hp)   f32      b_ih with b_hh[r], b_hh[z] folded in
    whh_ref : (Hp, 3*Hp)  cd       padded W_hh^T, gate-aligned column tiles
    bhhn_ref: (1, Hp)     f32      b_hh[n] (must stay inside r*(.))
    out_ref : (Bp, T, Hp) out dt   per-step hidden outputs (batch-major)
    gi_scr  : (T*Bp, 3*Hp) f32     per-chunk input projection
    h_scr   : (Bp, Hp)    f32      hidden state carried across grid steps
    """
    bp = h0_ref.shape[0]

    @pl.when(pl.program_id(0) == 0)
    def _():
        h_scr[...] = h0_ref[...]

    cd = whh_ref.dtype  # MXU compute dtype (f32 or bf16), f32 accumulation

    # Whole-chunk input projection: one MXU matmul, off the serial h->h chain.
    gi = jnp.dot(x_ref[...].astype(cd), wih_ref[...],
                 preferred_element_type=jnp.float32)
    gi_scr[...] = gi + bih_ref[...]

    whh = whh_ref[...]          # resident weights, loaded once per chunk
    bhhn = bhhn_ref[...]        # (1, Hp)
    h = h_scr[...]

    # Static unroll: every slice index is static and lane/sublane aligned.
    for t in range(tsteps):
        gi_t = gi_scr[pl.ds(t * bp, bp), :]                      # (Bp, 3Hp)
        gh = jnp.dot(h.astype(cd), whh, preferred_element_type=jnp.float32)
        r = jax.nn.sigmoid(gi_t[:, :hp] + gh[:, :hp])
        z = jax.nn.sigmoid(gi_t[:, hp:2 * hp] + gh[:, hp:2 * hp])
        n = jnp.tanh(gi_t[:, 2 * hp:] + r * (gh[:, 2 * hp:] + bhhn))
        h = n + z * (h - n)                                      # (1-z)n + z h
        out_ref[:, t, :] = h.astype(out_ref.dtype)

    h_scr[...] = h


@functools.partial(jax.jit, static_argnames=("chunk_t", "use_bf16_matmul"))
def variational_gru_forward(x, hidden, w_ih, w_hh, b_ih, b_hh, *,
                            chunk_t=32, use_bf16_matmul=False):
    """Pallas implementation of VariationalGRU.forward (eval mode).

    x      : (B, L, C)
    hidden : (num_layers, B, H)   (num_layers == 1)
    w_ih   : (3H, C)   (PyTorch GRUCell layout, gate order r, z, n)
    w_hh   : (3H, H)
    b_ih   : (3H,)
    b_hh   : (3H,)
    returns: (out, h_final) with out (B, L, H), h_final (B, H)
    """
    B, L, C = x.shape
    H = w_hh.shape[1]
    f32 = jnp.float32
    out_dtype = x.dtype
    cd = jnp.bfloat16 if use_bf16_matmul else f32

    Hp = _round_up(H, 128)                 # lane-aligned hidden size
    Bp = _round_up(B, 8)                   # sublane-aligned batch

    # Sublane multiple for the output block's second-to-last dim (T).
    isz_o = jnp.dtype(out_dtype).itemsize
    sub = 8 * max(1, 4 // max(isz_o, 1))   # f32 -> 8, bf16 -> 16
    T = min(_round_up(max(int(chunk_t), 1), sub), _round_up(L, sub))
    Lp = _round_up(L, T)
    n_chunks = Lp // T

    # --- Padded weights (gate g lives in columns [g*Hp, g*Hp + H)). ---------
    wih_t = jnp.transpose(w_ih.astype(f32)).reshape(C, 3, H)
    wih_pad = (jnp.zeros((C, 3, Hp), f32)
               .at[:, :, :H].set(wih_t).reshape(C, 3 * Hp).astype(cd))
    whh_t = jnp.transpose(w_hh.astype(f32)).reshape(H, 3, H)
    whh_pad = (jnp.zeros((Hp, 3, Hp), f32)
               .at[:H, :, :H].set(whh_t).reshape(Hp, 3 * Hp).astype(cd))

    # Fold b_hh[r], b_hh[z] into the input bias; keep b_hh[n] separate (it is
    # multiplied by r inside the cell, per torch.nn.GRUCell).
    bi = b_ih.astype(f32).reshape(3, H)
    bh = b_hh.astype(f32).reshape(3, H)
    bih_comb = bi.at[0].add(bh[0]).at[1].add(bh[1])
    bih_pad = jnp.zeros((3, Hp), f32).at[:, :H].set(bih_comb).reshape(1, 3 * Hp)
    bhhn_pad = jnp.zeros((1, Hp), f32).at[0, :H].set(bh[2])

    h0_pad = jnp.zeros((Bp, Hp), f32).at[:B, :H].set(hidden[-1].astype(f32))

    # --- Small time-major 2-D x: row index = t*Bp + b (C left unpadded). ----
    x_tm = jnp.swapaxes(x, 0, 1)                              # (L, B, C)
    x_pad = (jnp.zeros((Lp, Bp, C), x.dtype)
             .at[:L, :B, :].set(x_tm).reshape(Lp * Bp, C))

    # --- Explicit VMEM budget (double-buffered blocks + scratch). -----------
    isz_x = jnp.dtype(x.dtype).itemsize
    isz_w = jnp.dtype(cd).itemsize
    vmem_est = (2 * T * Bp * C * isz_x                       # x chunk
                + 2 * Bp * T * Hp * isz_o                    # out chunk
                + 2 * (C + Hp) * 3 * Hp * isz_w              # W_ih^T, W_hh^T
                + 2 * (3 * Hp + Hp + Bp * Hp) * 4            # biases + h0
                + T * Bp * 3 * Hp * 4 + Bp * Hp * 4)         # scratches
    vmem_limit = int(min(max(2 * vmem_est, 32 << 20), 64 << 20))

    kernel = functools.partial(_gru_chunk_kernel, tsteps=T, hp=Hp)

    out_pad = pl.pallas_call(
        kernel,
        out_shape=jax.ShapeDtypeStruct((Bp, Lp, Hp), out_dtype),
        grid_spec=pltpu.PrefetchScalarGridSpec(
            num_scalar_prefetch=0,
            grid=(n_chunks,),
            in_specs=[
                pl.BlockSpec((T * Bp, C), lambda l: (l, 0)),     # x chunk
                pl.BlockSpec((Bp, Hp), lambda l: (0, 0)),        # h0
                pl.BlockSpec((C, 3 * Hp), lambda l: (0, 0)),     # W_ih^T
                pl.BlockSpec((1, 3 * Hp), lambda l: (0, 0)),     # fused bias
                pl.BlockSpec((Hp, 3 * Hp), lambda l: (0, 0)),    # W_hh^T
                pl.BlockSpec((1, Hp), lambda l: (0, 0)),         # b_hh[n]
            ],
            out_specs=pl.BlockSpec((Bp, T, Hp), lambda l: (0, l, 0)),
            scratch_shapes=[
                pltpu.VMEM((T * Bp, 3 * Hp), jnp.float32),       # gi chunk
                pltpu.VMEM((Bp, Hp), jnp.float32),               # carried h
            ],
        ),
        compiler_params=pltpu.CompilerParams(
            dimension_semantics=("arbitrary",),   # sequential recurrence over L
            vmem_limit_bytes=vmem_limit,
        ),
    )(x_pad, h0_pad, wih_pad, bih_pad, whh_pad, bhhn_pad)

    out = out_pad[:B, :L, :H]            # batch-major already; no transpose pass
    h_final = out_pad[:B, L - 1, :H]
    return out, h_final


def _reference_forward(x, hidden, w_ih, w_hh, b_ih, b_hh):
    """Pure-JAX reference matching torch.nn.GRUCell semantics (eval mode)."""
    B, L, C = x.shape
    H = w_hh.shape[1]
    h = hidden[-1]
    outs = []
    for l in range(L):
        x_t = x[:, l, :]
        gi = x_t @ w_ih.T + b_ih
        gh = h @ w_hh.T + b_hh
        r = jax.nn.sigmoid(gi[:, :H] + gh[:, :H])
        z = jax.nn.sigmoid(gi[:, H:2 * H] + gh[:, H:2 * H])
        n = jnp.tanh(gi[:, 2 * H:] + r * gh[:, 2 * H:])
        h = (1.0 - z) * n + z * h
        outs.append(h)
    return jnp.stack(outs, axis=-2), h


if __name__ == "__main__":
    B, L, C, H = 2, 16, 16, 32
    num_layers = 1

    key = jax.random.PRNGKey(0)
    kx, kh, k1, k2, k3, k4 = jax.random.split(key, 6)

    x = jax.random.normal(kx, (B, L, C), dtype=jnp.float32)
    hidden = jax.random.normal(kh, (num_layers, B, H), dtype=jnp.float32)

    # Deterministic PyTorch-style init: U(-1/sqrt(H), 1/sqrt(H)).
    bound = 1.0 / (H ** 0.5)
    w_ih = jax.random.uniform(k1, (3 * H, C), minval=-bound, maxval=bound, dtype=jnp.float32)
    w_hh = jax.random.uniform(k2, (3 * H, H), minval=-bound, maxval=bound, dtype=jnp.float32)
    b_ih = jax.random.uniform(k3, (3 * H,), minval=-bound, maxval=bound, dtype=jnp.float32)
    b_hh = jax.random.uniform(k4, (3 * H,), minval=-bound, maxval=bound, dtype=jnp.float32)

    ref_out, ref_h = _reference_forward(x, hidden, w_ih, w_hh, b_ih, b_hh)

    # 1) Multi-chunk run (chunk_t=8 -> 2 grid steps): exercises the cross-chunk
    #    hidden-state carry through the VMEM scratch.
    out, h_final = variational_gru_forward(x, hidden, w_ih, w_hh, b_ih, b_hh, chunk_t=8)
    jax.block_until_ready((out, h_final))
    assert out.shape == (B, L, H) and h_final.shape == (B, H)
    assert jnp.allclose(out, ref_out, atol=1e-4, rtol=1e-4)
    assert jnp.allclose(h_final, ref_h, atol=1e-4, rtol=1e-4)

    # 2) Default large chunk (single grid step at this L).
    out2, h2 = variational_gru_forward(x, hidden, w_ih, w_hh, b_ih, b_hh)
    jax.block_until_ready((out2, h2))
    assert jnp.allclose(out2, ref_out, atol=1e-4, rtol=1e-4)
    assert jnp.allclose(h2, ref_h, atol=1e-4, rtol=1e-4)

    # 3) bf16 weights on the MXU path (precision tradeoff -> loose tolerance).
    out3, h3 = variational_gru_forward(x, hidden, w_ih, w_hh, b_ih, b_hh,
                                       use_bf16_matmul=True)
    jax.block_until_ready((out3, h3))
    assert float(jnp.max(jnp.abs(out3 - ref_out))) < 1e-1

    print("KERNEL_OK")
</pallas_src>

<mosaic_0001>
module attributes {stable_mosaic.version = 11 : i64} {
  func.func @_gru_chunk_kernel(%arg0: i32, %arg1: memref<64x16xf32, #tpu.memory_space<vmem>>, %arg2: memref<8x128xf32, #tpu.memory_space<vmem>>, %arg3: memref<16x384xf32, #tpu.memory_space<vmem>>, %arg4: memref<1x384xf32, #tpu.memory_space<vmem>>, %arg5: memref<128x384xf32, #tpu.memory_space<vmem>>, %arg6: memref<1x128xf32, #tpu.memory_space<vmem>>, %arg7: memref<8x8x128xf32, #tpu.memory_space<vmem>>, %arg8: memref<64x384xf32, #tpu.memory_space<vmem>>, %arg9: memref<8x128xf32, #tpu.memory_space<vmem>>) attributes {dimension_semantics = [#tpu.dimension_semantics<arbitrary>], iteration_bounds = array<i64: 2>, scalar_prefetch = 0 : i64, scratch_operands = 2 : i64, tpu.core_type = #tpu.core_type<tc>, window_params = [{transform_indices = @transform_0, window_bounds = array<i64: 64, 16>}, {pipeline_mode = #tpu.pipeline_mode<synchronous>, transform_indices = @transform_1, window_bounds = array<i64: 8, 128>}, {pipeline_mode = #tpu.pipeline_mode<synchronous>, transform_indices = @transform_2, window_bounds = array<i64: 16, 384>}, {pipeline_mode = #tpu.pipeline_mode<synchronous>, transform_indices = @transform_3, window_bounds = array<i64: 1, 384>}, {pipeline_mode = #tpu.pipeline_mode<synchronous>, transform_indices = @transform_4, window_bounds = array<i64: 128, 384>}, {pipeline_mode = #tpu.pipeline_mode<synchronous>, transform_indices = @transform_5, window_bounds = array<i64: 1, 128>}, {transform_indices = @transform_6, window_bounds = array<i64: 8, 8, 128>}]} {
    %c0_i32 = arith.constant 0 : i32
    %0 = arith.cmpi eq, %arg0, %c0_i32 : i32
    %1 = arith.extui %0 : i1 to i32
    %c0_i32_0 = arith.constant 0 : i32
    %2 = arith.cmpi ne, %1, %c0_i32_0 : i32
    scf.if %2 {
      %c0_66 = arith.constant 0 : index
      %c0_67 = arith.constant 0 : index
      %262 = vector.load %arg2[%c0_66, %c0_67] : memref<8x128xf32, #tpu.memory_space<vmem>>, vector<8x128xf32>
      %c0_68 = arith.constant 0 : index
      %c0_69 = arith.constant 0 : index
      %263 = vector.load %arg9[%c0_68, %c0_69] : memref<8x128xf32, #tpu.memory_space<vmem>>, vector<8x128xf32>
      tpu.vector_store %arg9[%c0_68, %c0_69], %262 {strides = array<i32>} : memref<8x128xf32, #tpu.memory_space<vmem>>, vector<8x128xf32>,
    } else {
    }
    %c0 = arith.constant 0 : index
    %c0_1 = arith.constant 0 : index
    %3 = vector.load %arg1[%c0, %c0_1] : memref<64x16xf32, #tpu.memory_space<vmem>>, vector<64x16xf32>
    %c0_2 = arith.constant 0 : index
    %c0_3 = arith.constant 0 : index
    %4 = vector.load %arg3[%c0_2, %c0_3] : memref<16x384xf32, #tpu.memory_space<vmem>>, vector<16x384xf32>
    %cst = arith.constant dense<0.000000e+00> : vector<64x384xf32>
    %5 = tpu.matmul %3, %4, %cst {dimension_numbers = #tpu.dot_dimension_numbers<[1], [0], [0], [1], [0, 0, 1, 1], [], []>} : vector<64x16xf32>, vector<16x384xf32>, vector<64x384xf32> -> vector<64x384xf32>
    %c0_4 = arith.constant 0 : index
    %c0_5 = arith.constant 0 : index
    %6 = vector.load %arg4[%c0_4, %c0_5] : memref<1x384xf32, #tpu.memory_space<vmem>>, vector<1x384xf32>
    %7 = vector.broadcast %6 : vector<1x384xf32> to vector<64x384xf32>
    %8 = arith.addf %5, %7 : vector<64x384xf32>
    %c0_6 = arith.constant 0 : index
    %c0_7 = arith.constant 0 : index
    %9 = vector.load %arg8[%c0_6, %c0_7] : memref<64x384xf32, #tpu.memory_space<vmem>>, vector<64x384xf32>
    tpu.vector_store %arg8[%c0_6, %c0_7], %8 {strides = array<i32>} : memref<64x384xf32, #tpu.memory_space<vmem>>, vector<64x384xf32>,
    %c0_8 = arith.constant 0 : index
    %c0_9 = arith.constant 0 : index
    %10 = vector.load %arg5[%c0_8, %c0_9] : memref<128x384xf32, #tpu.memory_space<vmem>>, vector<128x384xf32>
    %c0_10 = arith.constant 0 : index
    %c0_11 = arith.constant 0 : index
    %11 = vector.load %arg6[%c0_10, %c0_11] : memref<1x128xf32, #tpu.memory_space<vmem>>, vector<1x128xf32>
    %c0_12 = arith.constant 0 : index
    %c0_13 = arith.constant 0 : index
    %12 = vector.load %arg9[%c0_12, %c0_13] : memref<8x128xf32, #tpu.memory_space<vmem>>, vector<8x128xf32>
    %c0_14 = arith.constant 0 : index
    %c0_15 = arith.constant 0 : index
    %13 = vector.load %arg8[%c0_14, %c0_15] : memref<64x384xf32, #tpu.memory_space<vmem>>, vector<8x384xf32>
    %cst_16 = arith.constant dense<0.000000e+00> : vector<8x384xf32>
    %14 = tpu.matmul %12, %10, %cst_16 {dimension_numbers = #tpu.dot_dimension_numbers<[1], [0], [0], [1], [0, 0, 1, 1], [], []>} : vector<8x128xf32>, vector<128x384xf32>, vector<8x384xf32> -> vector<8x384xf32>
    %15 = vector.extract_strided_slice %13 {offsets = [0, 0], sizes = [8, 128], strides = [1, 1]} : vector<8x384xf32> to vector<8x128xf32>
    %16 = vector.extract_strided_slice %14 {offsets = [0, 0], sizes = [8, 128], strides = [1, 1]} : vector<8x384xf32> to vector<8x128xf32>
    %17 = arith.addf %15, %16 : vector<8x128xf32>
    %18 = arith.negf %17 : vector<8x128xf32>
    %19 = math.exp %18 : vector<8x128xf32>
    %cst_17 = arith.constant 1.000000e+00 : f32
    %20 = vector.broadcast %cst_17 : f32 to vector<8x128xf32>
    %21 = arith.addf %20, %19 : vector<8x128xf32>
    %22 = arith.divf %20, %21 : vector<8x128xf32>
    %23 = vector.extract_strided_slice %13 {offsets = [0, 128], sizes = [8, 128], strides = [1, 1]} : vector<8x384xf32> to vector<8x128xf32>
    %24 = vector.extract_strided_slice %14 {offsets = [0, 128], sizes = [8, 128], strides = [1, 1]} : vector<8x384xf32> to vector<8x128xf32>
    %25 = arith.addf %23, %24 : vector<8x128xf32>
    %26 = arith.negf %25 : vector<8x128xf32>
    %27 = math.exp %26 : vector<8x128xf32>
    %cst_18 = arith.constant 1.000000e+00 : f32
    %28 = vector.broadcast %cst_18 : f32 to vector<8x128xf32>
    %29 = arith.addf %28, %27 : vector<8x128xf32>
    %30 = arith.divf %28, %29 : vector<8x128xf32>
    %31 = vector.extract_strided_slice %13 {offsets = [0, 256], sizes = [8, 128], strides = [1, 1]} : vector<8x384xf32> to vector<8x128xf32>
    %32 = vector.extract_strided_slice %14 {offsets = [0, 256], sizes = [8, 128], strides = [1, 1]} : vector<8x384xf32> to vector<8x128xf32>
    %33 = vector.broadcast %11 : vector<1x128xf32> to vector<8x128xf32>
    %34 = arith.addf %32, %33 : vector<8x128xf32>
    %35 = arith.mulf %22, %34 : vector<8x128xf32>
    %36 = arith.addf %31, %35 : vector<8x128xf32>
    %37 = math.tanh %36 : vector<8x128xf32>
    %38 = arith.subf %12, %37 : vector<8x128xf32>
    %39 = arith.mulf %30, %38 : vector<8x128xf32>
    %40 = arith.addf %37, %39 : vector<8x128xf32>
    %c0_19 = arith.constant 0 : index
    %c0_20 = arith.constant 0 : index
    %c0_21 = arith.constant 0 : index
    %41 = vector.load %arg7[%c0_19, %c0_20, %c0_21] : memref<8x8x128xf32, #tpu.memory_space<vmem>>, vector<8x1x128xf32>
    %42 = vector.shape_cast %41 : vector<8x1x128xf32> to vector<8x128xf32>
    %43 = vector.shape_cast %40 : vector<8x128xf32> to vector<8x1x128xf32>
    tpu.vector_store %arg7[%c0_19, %c0_20, %c0_21], %43 {strides = array<i32>} : memref<8x8x128xf32, #tpu.memory_space<vmem>>, vector<8x1x128xf32>,
    %c8 = arith.constant 8 : index
    %c0_22 = arith.constant 0 : index
    %44 = vector.load %arg8[%c8, %c0_22] : memref<64x384xf32, #tpu.memory_space<vmem>>, vector<8x384xf32>
    %cst_23 = arith.constant dense<0.000000e+00> : vector<8x384xf32>
    %45 = tpu.matmul %40, %10, %cst_23 {dimension_numbers = #tpu.dot_dimension_numbers<[1], [0], [0], [1], [0, 0, 1, 1], [], []>} : vector<8x128xf32>, vector<128x384xf32>, vector<8x384xf32> -> vector<8x384xf32>
    %46 = vector.extract_strided_slice %44 {offsets = [0, 0], sizes = [8, 128], strides = [1, 1]} : vector<8x384xf32> to vector<8x128xf32>
    %47 = vector.extract_strided_slice %45 {offsets = [0, 0], sizes = [8, 128], strides = [1, 1]} : vector<8x384xf32> to vector<8x128xf32>
    %48 = arith.addf %46, %47 : vector<8x128xf32>
    %49 = arith.negf %48 : vector<8x128xf32>
    %50 = math.exp %49 : vector<8x128xf32>
    %cst_24 = arith.constant 1.000000e+00 : f32
    %51 = vector.broadcast %cst_24 : f32 to vector<8x128xf32>
    %52 = arith.addf %51, %50 : vector<8x128xf32>
    %53 = arith.divf %51, %52 : vector<8x128xf32>
    %54 = vector.extract_strided_slice %44 {offsets = [0, 128], sizes = [8, 128], strides = [1, 1]} : vector<8x384xf32> to vector<8x128xf32>
    %55 = vector.extract_strided_slice %45 {offsets = [0, 128], sizes = [8, 128], strides = [1, 1]} : vector<8x384xf32> to vector<8x128xf32>
    %56 = arith.addf %54, %55 : vector<8x128xf32>
    %57 = arith.negf %56 : vector<8x128xf32>
    %58 = math.exp %57 : vector<8x128xf32>
    %cst_25 = arith.constant 1.000000e+00 : f32
    %59 = vector.broadcast %cst_25 : f32 to vector<8x128xf32>
    %60 = arith.addf %59, %58 : vector<8x128xf32>
    %61 = arith.divf %59, %60 : vector<8x128xf32>
    %62 = vector.extract_strided_slice %44 {offsets = [0, 256], sizes = [8, 128], strides = [1, 1]} : vector<8x384xf32> to vector<8x128xf32>
    %63 = vector.extract_strided_slice %45 {offsets = [0, 256], sizes = [8, 128], strides = [1, 1]} : vector<8x384xf32> to vector<8x128xf32>
    %64 = vector.broadcast %11 : vector<1x128xf32> to vector<8x128xf32>
    %65 = arith.addf %63, %64 : vector<8x128xf32>
    %66 = arith.mulf %53, %65 : vector<8x128xf32>
    %67 = arith.addf %62, %66 : vector<8x128xf32>
    %68 = math.tanh %67 : vector<8x128xf32>
    %69 = arith.subf %40, %68 : vector<8x128xf32>
    %70 = arith.mulf %61, %69 : vector<8x128xf32>
    %71 = arith.addf %68, %70 : vector<8x128xf32>
    %c0_26 = arith.constant 0 : index
    %c1 = arith.constant 1 : index
    %c0_27 = arith.constant 0 : index
    %72 = vector.load %arg7[%c0_26, %c1, %c0_27] : memref<8x8x128xf32, #tpu.memory_space<vmem>>, vector<8x1x128xf32>
    %73 = vector.shape_cast %72 : vector<8x1x128xf32> to vector<8x128xf32>
    %74 = vector.shape_cast %71 : vector<8x128xf32> to vector<8x1x128xf32>
    tpu.vector_store %arg7[%c0_26, %c1, %c0_27], %74 {strides = array<i32>} : memref<8x8x128xf32, #tpu.memory_space<vmem>>, vector<8x1x128xf32>,
    %c16 = arith.constant 16 : index
    %c0_28 = arith.constant 0 : index
    %75 = vector.load %arg8[%c16, %c0_28] : memref<64x384xf32, #tpu.memory_space<vmem>>, vector<8x384xf32>
    %cst_29 = arith.constant dense<0.000000e+00> : vector<8x384xf32>
    %76 = tpu.matmul %71, %10, %cst_29 {dimension_numbers = #tpu.dot_dimension_numbers<[1], [0], [0], [1], [0, 0, 1, 1], [], []>} : vector<8x128xf32>, vector<128x384xf32>, vector<8x384xf32> -> vector<8x384xf32>
    %77 = vector.extract_strided_slice %75 {offsets = [0, 0], sizes = [8, 128], strides = [1, 1]} : vector<8x384xf32> to vector<8x128xf32>
    %78 = vector.extract_strided_slice %76 {offsets = [0, 0], sizes = [8, 128], strides = [1, 1]} : vector<8x384xf32> to vector<8x128xf32>
    %79 = arith.addf %77, %78 : vector<8x128xf32>
    %80 = arith.negf %79 : vector<8x128xf32>
    %81 = math.exp %80 : vector<8x128xf32>
    %cst_30 = arith.constant 1.000000e+00 : f32
    %82 = vector.broadcast %cst_30 : f32 to vector<8x128xf32>
    %83 = arith.addf %82, %81 : vector<8x128xf32>
    %84 = arith.divf %82, %83 : vector<8x128xf32>
    %85 = vector.extract_strided_slice %75 {offsets = [0, 128], sizes = [8, 128], strides = [1, 1]} : vector<8x384xf32> to vector<8x128xf32>
    %86 = vector.extract_strided_slice %76 {offsets = [0, 128], sizes = [8, 128], strides = [1, 1]} : vector<8x384xf32> to vector<8x128xf32>
    %87 = arith.addf %85, %86 : vector<8x128xf32>
    %88 = arith.negf %87 : vector<8x128xf32>
    %89 = math.exp %88 : vector<8x128xf32>
    %cst_31 = arith.constant 1.000000e+00 : f32
    %90 = vector.broadcast %cst_31 : f32 to vector<8x128xf32>
    %91 = arith.addf %90, %89 : vector<8x128xf32>
    %92 = arith.divf %90, %91 : vector<8x128xf32>
    %93 = vector.extract_strided_slice %75 {offsets = [0, 256], sizes = [8, 128], strides = [1, 1]} : vector<8x384xf32> to vector<8x128xf32>
    %94 = vector.extract_strided_slice %76 {offsets = [0, 256], sizes = [8, 128], strides = [1, 1]} : vector<8x384xf32> to vector<8x128xf32>
    %95 = vector.broadcast %11 : vector<1x128xf32> to vector<8x128xf32>
    %96 = arith.addf %94, %95 : vector<8x128xf32>
    %97 = arith.mulf %84, %96 : vector<8x128xf32>
    %98 = arith.addf %93, %97 : vector<8x128xf32>
    %99 = math.tanh %98 : vector<8x128xf32>
    %100 = arith.subf %71, %99 : vector<8x128xf32>
    %101 = arith.mulf %92, %100 : vector<8x128xf32>
    %102 = arith.addf %99, %101 : vector<8x128xf32>
    %c0_32 = arith.constant 0 : index
    %c2 = arith.constant 2 : index
    %c0_33 = arith.constant 0 : index
    %103 = vector.load %arg7[%c0_32, %c2, %c0_33] : memref<8x8x128xf32, #tpu.memory_space<vmem>>, vector<8x1x128xf32>
    %104 = vector.shape_cast %103 : vector<8x1x128xf32> to vector<8x128xf32>
    %105 = vector.shape_cast %102 : vector<8x128xf32> to vector<8x1x128xf32>
    tpu.vector_store %arg7[%c0_32, %c2, %c0_33], %105 {strides = array<i32>} : memref<8x8x128xf32, #tpu.memory_space<vmem>>, vector<8x1x128xf32>,
    %c24 = arith.constant 24 : index
    %c0_34 = arith.constant 0 : index
    %106 = vector.load %arg8[%c24, %c0_34] : memref<64x384xf32, #tpu.memory_space<vmem>>, vector<8x384xf32>
    %cst_35 = arith.constant dense<0.000000e+00> : vector<8x384xf32>
    %107 = tpu.matmul %102, %10, %cst_35 {dimension_numbers = #tpu.dot_dimension_numbers<[1], [0], [0], [1], [0, 0, 1, 1], [], []>} : vector<8x128xf32>, vector<128x384xf32>, vector<8x384xf32> -> vector<8x384xf32>
    %108 = vector.extract_strided_slice %106 {offsets = [0, 0], sizes = [8, 128], strides = [1, 1]} : vector<8x384xf32> to vector<8x128xf32>
    %109 = vector.extract_strided_slice %107 {offsets = [0, 0], sizes = [8, 128], strides = [1, 1]} : vector<8x384xf32> to vector<8x128xf32>
    %110 = arith.addf %108, %109 : vector<8x128xf32>
    %111 = arith.negf %110 : vector<8x128xf32>
    %112 = math.exp %111 : vector<8x128xf32>
    %cst_36 = arith.constant 1.000000e+00 : f32
    %113 = vector.broadcast %cst_36 : f32 to vector<8x128xf32>
    %114 = arith.addf %113, %112 : vector<8x128xf32>
    %115 = arith.divf %113, %114 : vector<8x128xf32>
    %116 = vector.extract_strided_slice %106 {offsets = [0, 128], sizes = [8, 128], strides = [1, 1]} : vector<8x384xf32> to vector<8x128xf32>
    %117 = vector.extract_strided_slice %107 {offsets = [0, 128], sizes = [8, 128], strides = [1, 1]} : vector<8x384xf32> to vector<8x128xf32>
    %118 = arith.addf %116, %117 : vector<8x128xf32>
    %119 = arith.negf %118 : vector<8x128xf32>
    %120 = math.exp %119 : vector<8x128xf32>
    %cst_37 = arith.constant 1.000000e+00 : f32
    %121 = vector.broadcast %cst_37 : f32 to vector<8x128xf32>
    %122 = arith.addf %121, %120 : vector<8x128xf32>
    %123 = arith.divf %121, %122 : vector<8x128xf32>
    %124 = vector.extract_strided_slice %106 {offsets = [0, 256], sizes = [8, 128], strides = [1, 1]} : vector<8x384xf32> to vector<8x128xf32>
    %125 = vector.extract_strided_slice %107 {offsets = [0, 256], sizes = [8, 128], strides = [1, 1]} : vector<8x384xf32> to vector<8x128xf32>
    %126 = vector.broadcast %11 : vector<1x128xf32> to vector<8x128xf32>
    %127 = arith.addf %125, %126 : vector<8x128xf32>
    %128 = arith.mulf %115, %127 : vector<8x128xf32>
    %129 = arith.addf %124, %128 : vector<8x128xf32>
    %130 = math.tanh %129 : vector<8x128xf32>
    %131 = arith.subf %102, %130 : vector<8x128xf32>
    %132 = arith.mulf %123, %131 : vector<8x128xf32>
    %133 = arith.addf %130, %132 : vector<8x128xf32>
    %c0_38 = arith.constant 0 : index
    %c3 = arith.constant 3 : index
    %c0_39 = arith.constant 0 : index
    %134 = vector.load %arg7[%c0_38, %c3, %c0_39] : memref<8x8x128xf32, #tpu.memory_space<vmem>>, vector<8x1x128xf32>
    %135 = vector.shape_cast %134 : vector<8x1x128xf32> to vector<8x128xf32>
    %136 = vector.shape_cast %133 : vector<8x128xf32> to vector<8x1x128xf32>
    tpu.vector_store %arg7[%c0_38, %c3, %c0_39], %136 {strides = array<i32>} : memref<8x8x128xf32, #tpu.memory_space<vmem>>, vector<8x1x128xf32>,
    %c32 = arith.constant 32 : index
    %c0_40 = arith.constant 0 : index
    %137 = vector.load %arg8[%c32, %c0_40] : memref<64x384xf32, #tpu.memory_space<vmem>>, vector<8x384xf32>
    %cst_41 = arith.constant dense<0.000000e+00> : vector<8x384xf32>
    %138 = tpu.matmul %133, %10, %cst_41 {dimension_numbers = #tpu.dot_dimension_numbers<[1], [0], [0], [1], [0, 0, 1, 1], [], []>} : vector<8x128xf32>, vector<128x384xf32>, vector<8x384xf32> -> vector<8x384xf32>
    %139 = vector.extract_strided_slice %137 {offsets = [0, 0], sizes = [8, 128], strides = [1, 1]} : vector<8x384xf32> to vector<8x128xf32>
    %140 = vector.extract_strided_slice %138 {offsets = [0, 0], sizes = [8, 128], strides = [1, 1]} : vector<8x384xf32> to vector<8x128xf32>
    %141 = arith.addf %139, %140 : vector<8x128xf32>
    %142 = arith.negf %141 : vector<8x128xf32>
    %143 = math.exp %142 : vector<8x128xf32>
    %cst_42 = arith.constant 1.000000e+00 : f32
    %144 = vector.broadcast %cst_42 : f32 to vector<8x128xf32>
    %145 = arith.addf %144, %143 : vector<8x128xf32>
    %146 = arith.divf %144, %145 : vector<8x128xf32>
    %147 = vector.extract_strided_slice %137 {offsets = [0, 128], sizes = [8, 128], strides = [1, 1]} : vector<8x384xf32> to vector<8x128xf32>
    %148 = vector.extract_strided_slice %138 {offsets = [0, 128], sizes = [8, 128], strides = [1, 1]} : vector<8x384xf32> to vector<8x128xf32>
    %149 = arith.addf %147, %148 : vector<8x128xf32>
    %150 = arith.negf %149 : vector<8x128xf32>
    %151 = math.exp %150 : vector<8x128xf32>
    %cst_43 = arith.constant 1.000000e+00 : f32
    %152 = vector.broadcast %cst_43 : f32 to vector<8x128xf32>
    %153 = arith.addf %152, %151 : vector<8x128xf32>
    %154 = arith.divf %152, %153 : vector<8x128xf32>
    %155 = vector.extract_strided_slice %137 {offsets = [0, 256], sizes = [8, 128], strides = [1, 1]} : vector<8x384xf32> to vector<8x128xf32>
    %156 = vector.extract_strided_slice %138 {offsets = [0, 256], sizes = [8, 128], strides = [1, 1]} : vector<8x384xf32> to vector<8x128xf32>
    %157 = vector.broadcast %11 : vector<1x128xf32> to vector<8x128xf32>
    %158 = arith.addf %156, %157 : vector<8x128xf32>
    %159 = arith.mulf %146, %158 : vector<8x128xf32>
    %160 = arith.addf %155, %159 : vector<8x128xf32>
    %161 = math.tanh %160 : vector<8x128xf32>
    %162 = arith.subf %133, %161 : vector<8x128xf32>
    %163 = arith.mulf %154, %162 : vector<8x128xf32>
    %164 = arith.addf %161, %163 : vector<8x128xf32>
    %c0_44 = arith.constant 0 : index
    %c4 = arith.constant 4 : index
    %c0_45 = arith.constant 0 : index
    %165 = vector.load %arg7[%c0_44, %c4, %c0_45] : memref<8x8x128xf32, #tpu.memory_space<vmem>>, vector<8x1x128xf32>
    %166 = vector.shape_cast %165 : vector<8x1x128xf32> to vector<8x128xf32>
    %167 = vector.shape_cast %164 : vector<8x128xf32> to vector<8x1x128xf32>
    tpu.vector_store %arg7[%c0_44, %c4, %c0_45], %167 {strides = array<i32>} : memref<8x8x128xf32, #tpu.memory_space<vmem>>, vector<8x1x128xf32>,
    %c40 = arith.constant 40 : index
    %c0_46 = arith.constant 0 : index
    %168 = vector.load %arg8[%c40, %c0_46] : memref<64x384xf32, #tpu.memory_space<vmem>>, vector<8x384xf32>
    %cst_47 = arith.constant dense<0.000000e+00> : vector<8x384xf32>
    %169 = tpu.matmul %164, %10, %cst_47 {dimension_numbers = #tpu.dot_dimension_numbers<[1], [0], [0], [1], [0, 0, 1, 1], [], []>} : vector<8x128xf32>, vector<128x384xf32>, vector<8x384xf32> -> vector<8x384xf32>
    %170 = vector.extract_strided_slice %168 {offsets = [0, 0], sizes = [8, 128], strides = [1, 1]} : vector<8x384xf32> to vector<8x128xf32>
    %171 = vector.extract_strided_slice %169 {offsets = [0, 0], sizes = [8, 128], strides = [1, 1]} : vector<8x384xf32> to vector<8x128xf32>
    %172 = arith.addf %170, %171 : vector<8x128xf32>
    %173 = arith.negf %172 : vector<8x128xf32>
    %174 = math.exp %173 : vector<8x128xf32>
    %cst_48 = arith.constant 1.000000e+00 : f32
    %175 = vector.broadcast %cst_48 : f32 to vector<8x128xf32>
    %176 = arith.addf %175, %174 : vector<8x128xf32>
    %177 = arith.divf %175, %176 : vector<8x128xf32>
    %178 = vector.extract_strided_slice %168 {offsets = [0, 128], sizes = [8, 128], strides = [1, 1]} : vector<8x384xf32> to vector<8x128xf32>
    %179 = vector.extract_strided_slice %169 {offsets = [0, 128], sizes = [8, 128], strides = [1, 1]} : vector<8x384xf32> to vector<8x128xf32>
    %180 = arith.addf %178, %179 : vector<8x128xf32>
    %181 = arith.negf %180 : vector<8x128xf32>
    %182 = math.exp %181 : vector<8x128xf32>
    %cst_49 = arith.constant 1.000000e+00 : f32
    %183 = vector.broadcast %cst_49 : f32 to vector<8x128xf32>
    %184 = arith.addf %183, %182 : vector<8x128xf32>
    %185 = arith.divf %183, %184 : vector<8x128xf32>
    %186 = vector.extract_strided_slice %168 {offsets = [0, 256], sizes = [8, 128], strides = [1, 1]} : vector<8x384xf32> to vector<8x128xf32>
    %187 = vector.extract_strided_slice %169 {offsets = [0, 256], sizes = [8, 128], strides = [1, 1]} : vector<8x384xf32> to vector<8x128xf32>
    %188 = vector.broadcast %11 : vector<1x128xf32> to vector<8x128xf32>
    %189 = arith.addf %187, %188 : vector<8x128xf32>
    %190 = arith.mulf %177, %189 : vector<8x128xf32>
    %191 = arith.addf %186, %190 : vector<8x128xf32>
    %192 = math.tanh %191 : vector<8x128xf32>
    %193 = arith.subf %164, %192 : vector<8x128xf32>
    %194 = arith.mulf %185, %193 : vector<8x128xf32>
    %195 = arith.addf %192, %194 : vector<8x128xf32>
    %c0_50 = arith.constant 0 : index
    %c5 = arith.constant 5 : index
    %c0_51 = arith.constant 0 : index
    %196 = vector.load %arg7[%c0_50, %c5, %c0_51] : memref<8x8x128xf32, #tpu.memory_space<vmem>>, vector<8x1x128xf32>
    %197 = vector.shape_cast %196 : vector<8x1x128xf32> to vector<8x128xf32>
    %198 = vector.shape_cast %195 : vector<8x128xf32> to vector<8x1x128xf32>
    tpu.vector_store %arg7[%c0_50, %c5, %c0_51], %198 {strides = array<i32>} : memref<8x8x128xf32, #tpu.memory_space<vmem>>, vector<8x1x128xf32>,
    %c48 = arith.constant 48 : index
    %c0_52 = arith.constant 0 : index
    %199 = vector.load %arg8[%c48, %c0_52] : memref<64x384xf32, #tpu.memory_space<vmem>>, vector<8x384xf32>
    %cst_53 = arith.constant dense<0.000000e+00> : vector<8x384xf32>
    %200 = tpu.matmul %195, %10, %cst_53 {dimension_numbers = #tpu.dot_dimension_numbers<[1], [0], [0], [1], [0, 0, 1, 1], [], []>} : vector<8x128xf32>, vector<128x384xf32>, vector<8x384xf32> -> vector<8x384xf32>
    %201 = vector.extract_strided_slice %199 {offsets = [0, 0], sizes = [8, 128], strides = [1, 1]} : vector<8x384xf32> to vector<8x128xf32>
    %202 = vector.extract_strided_slice %200 {offsets = [0, 0], sizes = [8, 128], strides = [1, 1]} : vector<8x384xf32> to vector<8x128xf32>
    %203 = arith.addf %201, %202 : vector<8x128xf32>
    %204 = arith.negf %203 : vector<8x128xf32>
    %205 = math.exp %204 : vector<8x128xf32>
    %cst_54 = arith.constant 1.000000e+00 : f32
    %206 = vector.broadcast %cst_54 : f32 to vector<8x128xf32>
    %207 = arith.addf %206, %205 : vector<8x128xf32>
    %208 = arith.divf %206, %207 : vector<8x128xf32>
    %209 = vector.extract_strided_slice %199 {offsets = [0, 128], sizes = [8, 128], strides = [1, 1]} : vector<8x384xf32> to vector<8x128xf32>
    %210 = vector.extract_strided_slice %200 {offsets = [0, 128], sizes = [8, 128], strides = [1, 1]} : vector<8x384xf32> to vector<8x128xf32>
    %211 = arith.addf %209, %210 : vector<8x128xf32>
    %212 = arith.negf %211 : vector<8x128xf32>
    %213 = math.exp %212 : vector<8x128xf32>
    %cst_55 = arith.constant 1.000000e+00 : f32
    %214 = vector.broadcast %cst_55 : f32 to vector<8x128xf32>
    %215 = arith.addf %214, %213 : vector<8x128xf32>
    %216 = arith.divf %214, %215 : vector<8x128xf32>
    %217 = vector.extract_strided_slice %199 {offsets = [0, 256], sizes = [8, 128], strides = [1, 1]} : vector<8x384xf32> to vector<8x128xf32>
    %218 = vector.extract_strided_slice %200 {offsets = [0, 256], sizes = [8, 128], strides = [1, 1]} : vector<8x384xf32> to vector<8x128xf32>
    %219 = vector.broadcast %11 : vector<1x128xf32> to vector<8x128xf32>
    %220 = arith.addf %218, %219 : vector<8x128xf32>
    %221 = arith.mulf %208, %220 : vector<8x128xf32>
    %222 = arith.addf %217, %221 : vector<8x128xf32>
    %223 = math.tanh %222 : vector<8x128xf32>
    %224 = arith.subf %195, %223 : vector<8x128xf32>
    %225 = arith.mulf %216, %224 : vector<8x128xf32>
    %226 = arith.addf %223, %225 : vector<8x128xf32>
    %c0_56 = arith.constant 0 : index
    %c6 = arith.constant 6 : index
    %c0_57 = arith.constant 0 : index
    %227 = vector.load %arg7[%c0_56, %c6, %c0_57] : memref<8x8x128xf32, #tpu.memory_space<vmem>>, vector<8x1x128xf32>
    %228 = vector.shape_cast %227 : vector<8x1x128xf32> to vector<8x128xf32>
    %229 = vector.shape_cast %226 : vector<8x128xf32> to vector<8x1x128xf32>
    tpu.vector_store %arg7[%c0_56, %c6, %c0_57], %229 {strides = array<i32>} : memref<8x8x128xf32, #tpu.memory_space<vmem>>, vector<8x1x128xf32>,
    %c56 = arith.constant 56 : index
    %c0_58 = arith.constant 0 : index
    %230 = vector.load %arg8[%c56, %c0_58] : memref<64x384xf32, #tpu.memory_space<vmem>>, vector<8x384xf32>
    %cst_59 = arith.constant dense<0.000000e+00> : vector<8x384xf32>
    %231 = tpu.matmul %226, %10, %cst_59 {dimension_numbers = #tpu.dot_dimension_numbers<[1], [0], [0], [1], [0, 0, 1, 1], [], []>} : vector<8x128xf32>, vector<128x384xf32>, vector<8x384xf32> -> vector<8x384xf32>
    %232 = vector.extract_strided_slice %230 {offsets = [0, 0], sizes = [8, 128], strides = [1, 1]} : vector<8x384xf32> to vector<8x128xf32>
    %233 = vector.extract_strided_slice %231 {offsets = [0, 0], sizes = [8, 128], strides = [1, 1]} : vector<8x384xf32> to vector<8x128xf32>
    %234 = arith.addf %232, %233 : vector<8x128xf32>
    %235 = arith.negf %234 : vector<8x128xf32>
    %236 = math.exp %235 : vector<8x128xf32>
    %cst_60 = arith.constant 1.000000e+00 : f32
    %237 = vector.broadcast %cst_60 : f32 to vector<8x128xf32>
    %238 = arith.addf %237, %236 : vector<8x128xf32>
    %239 = arith.divf %237, %238 : vector<8x128xf32>
    %240 = vector.extract_strided_slice %230 {offsets = [0, 128], sizes = [8, 128], strides = [1, 1]} : vector<8x384xf32> to vector<8x128xf32>
    %241 = vector.extract_strided_slice %231 {offsets = [0, 128], sizes = [8, 128], strides = [1, 1]} : vector<8x384xf32> to vector<8x128xf32>
    %242 = arith.addf %240, %241 : vector<8x128xf32>
    %243 = arith.negf %242 : vector<8x128xf32>
    %244 = math.exp %243 : vector<8x128xf32>
    %cst_61 = arith.constant 1.000000e+00 : f32
    %245 = vector.broadcast %cst_61 : f32 to vector<8x128xf32>
    %246 = arith.addf %245, %244 : vector<8x128xf32>
    %247 = arith.divf %245, %246 : vector<8x128xf32>
    %248 = vector.extract_strided_slice %230 {offsets = [0, 256], sizes = [8, 128], strides = [1, 1]} : vector<8x384xf32> to vector<8x128xf32>
    %249 = vector.extract_strided_slice %231 {offsets = [0, 256], sizes = [8, 128], strides = [1, 1]} : vector<8x384xf32> to vector<8x128xf32>
    %250 = vector.broadcast %11 : vector<1x128xf32> to vector<8x128xf32>
    %251 = arith.addf %249, %250 : vector<8x128xf32>
    %252 = arith.mulf %239, %251 : vector<8x128xf32>
    %253 = arith.addf %248, %252 : vector<8x128xf32>
    %254 = math.tanh %253 : vector<8x128xf32>
    %255 = arith.subf %226, %254 : vector<8x128xf32>
    %256 = arith.mulf %247, %255 : vector<8x128xf32>
    %257 = arith.addf %254, %256 : vector<8x128xf32>
    %c0_62 = arith.constant 0 : index
    %c7 = arith.constant 7 : index
    %c0_63 = arith.constant 0 : index
    %258 = vector.load %arg7[%c0_62, %c7, %c0_63] : memref<8x8x128xf32, #tpu.memory_space<vmem>>, vector<8x1x128xf32>
    %259 = vector.shape_cast %258 : vector<8x1x128xf32> to vector<8x128xf32>
    %260 = vector.shape_cast %257 : vector<8x128xf32> to vector<8x1x128xf32>
    tpu.vector_store %arg7[%c0_62, %c7, %c0_63], %260 {strides = array<i32>} : memref<8x8x128xf32, #tpu.memory_space<vmem>>, vector<8x1x128xf32>,
    %c0_64 = arith.constant 0 : index
    %c0_65 = arith.constant 0 : index
    %261 = vector.load %arg9[%c0_64, %c0_65] : memref<8x128xf32, #tpu.memory_space<vmem>>, vector<8x128xf32>
    tpu.vector_store %arg9[%c0_64, %c0_65], %257 {strides = array<i32>} : memref<8x128xf32, #tpu.memory_space<vmem>>, vector<8x128xf32>,
    return
  }
  func.func @transform_0(%arg0: i32) -> (i32, i32) {
    %c0_i32 = arith.constant 0 : i32
    %c0_i32_0 = arith.constant 0 : i32
    return %arg0, %c0_i32 : i32, i32
  }
  func.func @transform_1(%arg0: i32) -> (i32, i32) {
    %c0_i32 = arith.constant 0 : i32
    %c0_i32_0 = arith.constant 0 : i32
    %c0_i32_1 = arith.constant 0 : i32
    return %c0_i32, %c0_i32_0 : i32, i32
  }
  func.func @transform_2(%arg0: i32) -> (i32, i32) {
    %c0_i32 = arith.constant 0 : i32
    %c0_i32_0 = arith.constant 0 : i32
    %c0_i32_1 = arith.constant 0 : i32
    return %c0_i32, %c0_i32_0 : i32, i32
  }
  func.func @transform_3(%arg0: i32) -> (i32, i32) {
    %c0_i32 = arith.constant 0 : i32
    %c0_i32_0 = arith.constant 0 : i32
    %c0_i32_1 = arith.constant 0 : i32
    return %c0_i32, %c0_i32_0 : i32, i32
  }
  func.func @transform_4(%arg0: i32) -> (i32, i32) {
    %c0_i32 = arith.constant 0 : i32
    %c0_i32_0 = arith.constant 0 : i32
    %c0_i32_1 = arith.constant 0 : i32
    return %c0_i32, %c0_i32_0 : i32, i32
  }
  func.func @transform_5(%arg0: i32) -> (i32, i32) {
    %c0_i32 = arith.constant 0 : i32
    %c0_i32_0 = arith.constant 0 : i32
    %c0_i32_1 = arith.constant 0 : i32
    return %c0_i32, %c0_i32_0 : i32, i32
  }
  func.func @transform_6(%arg0: i32) -> (i32, i32, i32) {
    %c0_i32 = arith.constant 0 : i32
    %c0_i32_0 = arith.constant 0 : i32
    %c0_i32_1 = arith.constant 0 : i32
    return %c0_i32, %arg0, %c0_i32_0 : i32, i32, i32
  }
}

</mosaic_0001>

<bundles_post_ra>
// kernel: variational_gru_forward.1
= control target key start
LH: loop header
LB: loop body
LE: loop exit
PB: predicated region body
PF: predicated region fallthrough
CT: control target
= control target key end

     0   :  { %s3756_s21 = smov 0   ;;  %s3758_s22 = smov 0   ;;  %s4565_s0 = inlined_call_operand.vmem [shape: f32[128,16], index: 0, kind: input, shape index: {}]   ;;  %s4566_s1 = inlined_call_operand.vmem [shape: f32[8,128], index: 1, kind: input, shape index: {}]   ;;  %s4567_s2 = inlined_call_operand.vmem [shape: f32[16,384], index: 2, kind: input, shape index: {}]   ;;  %s4568_s3 = inlined_call_operand.vmem [shape: f32[1,384], index: 3, kind: input, shape index: {}]   ;;  %s4569_s4 = inlined_call_operand.vmem [shape: f32[128,384], index: 4, kind: input, shape index: {}]   ;;  %s4570_s5 = inlined_call_operand.vmem [shape: f32[1,128], index: 5, kind: input, shape index: {}]   ;;  %s4571_s6 = inlined_call_operand.vmem [shape: f32[8,16,128], index: 6, kind: output, shape index: {}]  }
   0x1   :  { %s3760_s23 = smov 0  }
   0x2 LB: > { %s2576_s24 = sadd.s32 4294967295, %s3715_s23   ;;  %s3767_s25 = sadd.s32 1, %s3715_s23   ;;  %s3715_s23 = sphi %s3760_s23, %s4575_s23   ;;  %s3711_s22 = sphi %s3758_s22, %s4574_s22   ;;  %s3707_s21 = sphi %s3756_s21, %s4573_s21  }
   0x3   : > { %s151_s26 = ssub.s32 %s3715_s23, %s3767_s25  ;;  %s154_s27 = sadd.s32 1, %s3711_s22 }
   0x4   : > { %p152_p0 = scmp.eq.s32.totalorder %s151_s26, 0  ;;  %p164_p1 = scmp.ne.s32.totalorder %s3711_s22, %s3707_s21 }
   0x5   : > { %p165_p2 = scmp.eq.s32.totalorder %s2576_s24, 1  ;;  %p2580_p3 = scmp.ge.s32.totalorder %s3715_s23, 1 }
   0x6   : > { %s3773_s28 = scalar_select %p152_p0, %s3711_s22, %s154_s27  }
   0x7   : > { %p3775_p4 = por %p165_p2, %p164_p1  ;;  %p213_p5 = scmp.lt.s32.totalorder %s3715_s23, 3 }
   0x9   : > { %p214_p6 = pnand %p2580_p3, %p213_p5 }
   0xa   : > { %s239_s30 = sand.u32 (!%p214_p6), 1, %s3707_s21   ;;  %s3779_s7 = sshll.u32 (!%p214_p6), %s2576_s24, 3 }
   0xb   : > { %217 = sbr.rel (%p214_p6) target bundleno = 2172 (0x87c), region = 44  ;;  %s2581_s8 = sshll.u32 (!%p214_p6), %s239_s30, 6 }
   0xc   : > { %p243_p7 = scmp.lt.s32.totalorder (!%p214_p6), %s3779_s7, 15  ;;  %s3788_s14 = scalar_lea.vmem (!%p214_p6), [#allocation4], %s2581_s8 }
   0xd   : > { %p2584_p8 = scmp.ne.s32.totalorder (!%p214_p6), %s2576_s24, 0 }
  0x12   : > { %s244_s9 = scalar_select %p243_p7, %s3779_s7, 15 }
  0x13   : > { %251 = sbr.rel (%p2584_p8) target bundleno = 26 (0x1a), region = 48  ;;  %v252_v0 = vld [vmem:[%s4566_s1] sm:$0xff] (!%p2584_p8) }
  0x14   : > { %s2583_s10 = sshll.u32 %s244_s9, 3  ;;  %253 = vst [vmem:[#allocation3] sm:$0xff] (!%p2584_p8), %v252_v0 }
  0x15   : > { %s3786_s13 = scalar_lea.vmem %s4565_s0, %s2583_s10 }
  0x1a PF: > { %v263_v1 = vld [vmem:[%s4567_s2 + $0x8] sm:$0xff]  ;;  %v266_v2 = vld [vmem:[%s4567_s2 + $0x20] sm:$0xff]  ;;  %v265_v5 = vld [vmem:[%s4567_s2 + $0x18] sm:$0xff]  ;;  %v3717_v6 = vmov 0.0   ;;  %vm285_vm0 = vcmask 130048   ;;  %v3718_v49 = vmov 0.0|0.0   ;;  %s2465_s11 = scalar_lea.vmem (%p3775_p4), %s4571_s6, %s3779_s7 }
  0x1b   : > { %v262_v3 = vld [vmem:[%s4567_s2] sm:$0xff]  ;;  %v3096_v4 = vpack.c.bf16 %v266_v2, %v263_v1  ;;  %374 = vmatprep.mubr.f32.mxu0 %v3717_v6  ;;  %v553_v8 = vld [vmem:[%s4569_s4 + $0x8] sm:$0xff]  ;;  %v555_v12 = vld [vmem:[%s4569_s4 + $0x18] sm:$0xff]  ;;  %vm3719_vm1 = vmmov 0  }
  0x1c   : > { %v254_v7 = vld [vmem:[%s3786_s13] sm:$0xff]  ;;  %v3098_v9 = vpack.c.bf16 %v265_v5, %v262_v3  ;;  %v559_v14 = vld [vmem:[%s4569_s4 + $0x38] sm:$0xff]  ;;  %v562_v15 = vld [vmem:[%s4569_s4 + $0x50] sm:$0xff] }
  0x1d   : > { %v556_v10 = vld [vmem:[%s4569_s4 + $0x20] sm:$0xff]  ;;  %2804 = vmatprep.mubr.msk.f32.mxu1 %vm285_vm0, %v254_v7  ;;  %3097 = vmatprep.subr.bf16.mxu0 %v3096_v4  ;;  %v3831_v17 = vpack.c.bf16 %v562_v15, %v559_v14  ;;  %v558_v18 = vld [vmem:[%s4569_s4 + $0x30] sm:$0xff]  ;;  %v561_v19 = vld [vmem:[%s4569_s4 + $0x48] sm:$0xff] }
  0x1e   : > { %v552_v11 = vld [vmem:[%s4569_s4] sm:$0xff]  ;;  %v3820_v13 = vpack.c.bf16 %v556_v10, %v553_v8  ;;  %3099 = vmatpush1.bf16.msra.mxu0 %v3098_v9  ;;  %v565_v20 = vld [vmem:[%s4569_s4 + $0x68] sm:$0xff]  ;;  %v3849_v23 = vpack.c.bf16 %v561_v19, %v558_v18  ;;  %v567_v26 = vld [vmem:[%s4569_s4 + $0x78] sm:$0xff] }
  0x1f   : > { %v3828_v16 = vpack.c.bf16 %v555_v12, %v552_v11  ;;  %v568_v21 = vld [vmem:[%s4569_s4 + $0x80] sm:$0xff]  ;;  %v255_v22 = vld [vmem:[%s3786_s13 + $0x8] sm:$0xff]  ;;  %v571_v27 = vld [vmem:[%s4569_s4 + $0x98] sm:$0xff] }
  0x20   : > { %3105 = vmatprep.subr.bf16.mxu0 %v3820_v13  ;;  %v3852_v24 = vpack.c.bf16 %v568_v21, %v565_v20  ;;  %v564_v25 = vld [vmem:[%s4569_s4 + $0x60] sm:$0xff]  ;;  %v574_v28 = vld [vmem:[%s4569_s4 + $0xb0] sm:$0xff]  ;;  %v267_v30 = vld [vmem:[%s4567_s2 + $0x28] sm:$0xff] }
  0x21   : > { %2585 = vmatmul.mubr.msk.f32.vlgmr.msra.gmra.mrb[0].mxu0 %vm285_vm0, %v254_v7  ;;  %v264_v29 = vld [vmem:[%s4567_s2 + $0x10] sm:$0xff]  ;;  %v3876_v32 = vpack.c.bf16 %v567_v26, %v564_v25  ;;  %v3879_v34 = vpack.c.bf16 %v574_v28, %v571_v27  ;;  %v573_v36 = vld [vmem:[%s4569_s4 + $0xa8] sm:$0xff]  ;;  %v580_v39 = vld [vmem:[%s4569_s4 + $0xe0] sm:$0xff] }
  0x22   : > { %3107 = vmatpush1.bf16.msra.mxu0 %v3828_v16  ;;  %380 = vmatprep.mubr.f32.mxu0 %v3717_v6  ;;  %v256_v31 = vld [vmem:[%s3786_s13 + $0x10] sm:$0xff]  ;;  %v3100_v33 = vpack.c.bf16 %v267_v30, %v264_v29  ;;  %v577_v38 = vld [vmem:[%s4569_s4 + $0xc8] sm:$0xff]  ;;  %v257_v42 = vld [vmem:[%s3786_s13 + $0x18] sm:$0xff] }
  0x23   : > { %3109 = vmatprep.subr.bf16.mxu0 %v3831_v17  ;;  %v570_v35 = vld [vmem:[%s4569_s4 + $0x90] sm:$0xff]  ;;  %v557_v40 = vld [vmem:[%s4569_s4 + $0x28] sm:$0xff]  ;;  %v560_v44 = vld [vmem:[%s4569_s4 + $0x40] sm:$0xff]  ;;  %v3914_v46 = vpack.c.bf16 %v580_v39, %v577_v38 }
  0x24   : > { %v554_v37 = vld [vmem:[%s4569_s4 + $0x10] sm:$0xff]  ;;  %3101 = vmatprep.subr.bf16.mxu1 %v3100_v33  ;;  %v3905_v43 = vpack.c.bf16 %v573_v36, %v570_v35  ;;  %v563_v45 = vld [vmem:[%s4569_s4 + $0x58] sm:$0xff]  ;;  %v576_v47 = vld [vmem:[%s4569_s4 + $0xc0] sm:$0xff] }
  0x25   : > { %2586 = vmatmul.mubr.msk.f32.gmra.mrb[2].mxu0 %vm285_vm0, %v255_v22  ;;  %3103 = vmatpush3.bf16.msra.mxu1 %v3100_v33  ;;  %v3900_v41 = vpack.c.bf16 %v557_v40, %v554_v37  ;;  %v579_v48 = vld [vmem:[%s4569_s4 + $0xd8] sm:$0xff]  ;;  %v586_v51 = vld [vmem:[%s4569_s4 + $0x110] sm:$0xff]  ;;  %v3932_v52 = vpack.c.bf16 %v563_v45, %v560_v44  ;;  %v258_v53 = vld [vmem:[%s3786_s13 + $0x20] sm:$0xff]  ;;  %v270_v37 = vlaneseq }
  0x26   : > { %3111 = vmatpush1.bf16.msra.mxu0 %v3849_v23  ;;  %386 = vmatprep.mubr.f32.mxu0 %v3717_v6  ;;  %v583_v50 = vld [vmem:[%s4569_s4 + $0xf8] sm:$0xff]  ;;  %v3937_v54 = vpack.c.bf16 %v579_v48, %v576_v47  ;;  %v566_v55 = vld [vmem:[%s4569_s4 + $0x70] sm:$0xff]  ;;  %v569_v56 = vld [vmem:[%s4569_s4 + $0x88] sm:$0xff] }
  0x27   : > { %3113 = vmatprep.subr.bf16.mxu0 %v3852_v24  ;;  %3136 = vmatprep.subr.bf16.mxu1 %v3718_v49  ;;  %v3946_v57 = vpack.c.bf16 %v586_v51, %v583_v50  ;;  %v582_v58 = vld [vmem:[%s4569_s4 + $0xf0] sm:$0xff]  ;;  %v585_v59 = vld [vmem:[%s4569_s4 + $0x108] sm:$0xff]  ;;  %v592_v61 = vld [vmem:[%s4569_s4 + $0x140] sm:$0xff]  ;;  %v3964_v62 = vpack.c.bf16 %v569_v56, %v566_v55  ;;  %v271_v38 = vshrl.u32 %v270_v37, 7 }
  0x28   : > { %2805 = vmatmul.mubr.msk.f32.vlgmr.msra.gmra.mrb[0].mxu1 %vm285_vm0, %v255_v22  ;;  %v589_v60 = vld [vmem:[%s4569_s4 + $0x128] sm:$0xff]  ;;  %v3969_v0 = vpack.c.bf16 %v585_v59, %v582_v58  ;;  %v572_v1 = vld [vmem:[%s4569_s4 + $0xa0] sm:$0xff]  ;;  %v575_v2 = vld [vmem:[%s4569_s4 + $0xb8] sm:$0xff] }
  0x29   : > { %2587 = vmatmul.mubr.msk.f32.gmra.mrb[4].mxu0 %vm285_vm0, %v256_v31  ;;  %3138 = vmatpush3.bf16.msra.mxu1 %v3900_v41  ;;  %v259_v63 = vld [vmem:[%s3786_s13 + $0x28] sm:$0xff]  ;;  %v3978_v3 = vpack.c.bf16 %v592_v61, %v589_v60  ;;  %v588_v4 = vld [vmem:[%s4569_s4 + $0x120] sm:$0xff]  ;;  %v591_v5 = vld [vmem:[%s4569_s4 + $0x138] sm:$0xff]  ;;  %v3996_v9 = vpack.c.bf16 %v575_v2, %v572_v1  ;;  %v280_v39 = vsub.s32 2, %v271_v38  ;;  %v272_v55 = vsub.s32 0, %v271_v38 }
  0x2a   : > { %3115 = vmatpush1.bf16.msra.mxu0 %v3876_v32  ;;  %392 = vmatprep.mubr.f32.mxu0 %v3717_v6  ;;  %v595_v7 = vld [vmem:[%s4569_s4 + $0x158] sm:$0xff]  ;;  %v598_v8 = vld [vmem:[%s4569_s4 + $0x170] sm:$0xff]  ;;  %v4001_v11 = vpack.c.bf16 %v591_v5, %v588_v4  ;;  %v581_v14 = vld [vmem:[%s4569_s4 + $0xe8] sm:$0xff] }
  0x2b   : > { %3117 = vmatprep.subr.bf16.mxu0 %v3879_v34  ;;  %3139 = vmatprep.subr.bf16.mxu1 %v3718_v49  ;;  %v260_v10 = vld [vmem:[%s3786_s13 + $0x30] sm:$0xff]  ;;  %v4010_v15 = vpack.c.bf16 %v598_v8, %v595_v7  ;;  %v597_v19 = vld [vmem:[%s4569_s4 + $0x168] sm:$0xff]  ;;  %v261_v21 = vld [vmem:[%s3786_s13 + $0x38] sm:$0xff]  ;;  %v276_v7 = vsub.s32 1, %v271_v38 }
  0x2c   : > { %2807 = vmatprep.mubr.msk.f32.mxu1 %vm285_vm0, %v256_v31  ;;  %v578_v12 = vld [vmem:[%s4569_s4 + $0xd0] sm:$0xff]  ;;  %v584_v25 = vld [vmem:[%s4569_s4 + $0x100] sm:$0xff]  ;;  %v587_v26 = vld [vmem:[%s4569_s4 + $0x118] sm:$0xff] }
  0x2d   : > { %2588 = vmatmul.mubr.msk.f32.gmra.mrb[6].mxu0 %vm285_vm0, %v257_v42  ;;  %3141 = vmatpush3.bf16.msra.mxu1 %v3932_v52  ;;  %v594_v18 = vld [vmem:[%s4569_s4 + $0x150] sm:$0xff]  ;;  %v4022_v20 = vpack.c.bf16 %v581_v14, %v578_v12  ;;  %v4040_v27 = vpack.c.bf16 %v587_v26, %v584_v25  ;;  %v4044_v28 = vld [vmem:[#allocation3] sm:$0xff]  ;;  %v593_v30 = vld [vmem:[%s4569_s4 + $0x148] sm:$0xff] }
  0x2e   : > { %3119 = vmatpush1.bf16.msra.mxu0 %v3905_v43  ;;  %398 = vmatprep.mubr.f32.mxu0 %v3717_v6  ;;  %v4027_v22 = vpack.c.bf16 %v597_v19, %v594_v18  ;;  %v590_v29 = vld [vmem:[%s4569_s4 + $0x130] sm:$0xff]  ;;  %v596_v33 = vld [vmem:[%s4569_s4 + $0x160] sm:$0xff]  ;;  %v599_v35 = vld [vmem:[%s4569_s4 + $0x178] sm:$0xff] }
  0x2f   : > { %3121 = vmatprep.subr.bf16.mxu0 %v3914_v46  ;;  %3142 = vmatprep.subr.bf16.mxu1 %v3718_v49  ;;  %v4058_v31 = vpack.c.bf16 %v593_v30, %v590_v29  ;;  %v4073_v36 = vpack.c.bf16 %v599_v35, %v596_v33  ;;  %v268_v40 = vld [vmem:[%s4568_s3] sm:$0x7] }
  0x30   : > { %2808 = vmatmul.mubr.msk.f32.gmra.mrb[2].mxu1 %vm285_vm0, %v257_v42  ;;  %v281_v42 = vrot.slane %v268_v40, %v280_v39  ;;  %v4122_v60 = vrot.slane %v268_v40, %v272_v55  ;;  %v4131_v14 = vrot.slane %v268_v40, %v276_v7  ;;  %v4137_v30 = vld [vmem:[%s4570_s5] ss:$0 sm:$0xff] }
  0x31   : > { %2589 = vmatmul.mubr.msk.f32.gmra.mrb[8].mxu0 %vm285_vm0, %v258_v53  ;;  %3144 = vmatpush3.bf16.msra.mxu1 %v3964_v62 }
  0x32   : > { %3123 = vmatpush1.bf16.msra.mxu0 %v3937_v54  ;;  %404 = vmatprep.mubr.f32.mxu0 %v3717_v6 }
  0x33   : > { %3125 = vmatprep.subr.bf16.mxu0 %v3946_v57  ;;  %3145 = vmatprep.subr.bf16.mxu1 %v3718_v49 }
  0x34   : > { %2810 = vmatprep.mubr.msk.f32.mxu1 %vm285_vm0, %v258_v53 }
  0x35   : > { %2590 = vmatmul.mubr.msk.f32.gmra.mrb[10].mxu0 %vm285_vm0, %v259_v63  ;;  %3147 = vmatpush3.bf16.msra.mxu1 %v3996_v9 }
  0x36   : > { %3127 = vmatpush1.bf16.msra.mxu0 %v3969_v0  ;;  %410 = vmatprep.mubr.f32.mxu0 %v3717_v6 }
  0x37   : > { %3129 = vmatprep.subr.bf16.mxu0 %v3978_v3  ;;  %3148 = vmatprep.subr.bf16.mxu1 %v3718_v49 }
  0x38   : > { %2811 = vmatmul.mubr.msk.f32.gmra.mrb[4].mxu1 %vm285_vm0, %v259_v63 }
  0x39   : > { %2591 = vmatmul.mubr.msk.f32.gmra.mrb[12].mxu0 %vm285_vm0, %v260_v10  ;;  %3150 = vmatpush3.bf16.msra.mxu1 %v4022_v20 }
  0x3a   : > { %3131 = vmatpush1.bf16.msra.mxu0 %v4001_v11  ;;  %416 = vmatprep.mubr.f32.mxu0 %v3717_v6 }
  0x3b   : > { %3133 = vmatprep.subr.bf16.mxu0 %v4010_v15  ;;  %3151 = vmatprep.subr.bf16.mxu1 %v3718_v49 }
  0x3c   : > { %2813 = vmatprep.mubr.msk.f32.mxu1 %vm285_vm0, %v260_v10 }
  0x3d   : > { %2592 = vmatmul.mubr.msk.f32.gmra.mrb[14].mxu0 %vm285_vm0, %v261_v21  ;;  %2814 = vmatmul.mubr.msk.f32.gmra.mrb[6].mxu1 %vm285_vm0, %v261_v21 }
  0x3e   : > { %3135 = vmatpush1.bf16.msra.mxu0 %v4027_v22  ;;  %669 = vmatprep.mubr.f32.mxu0 %v3717_v6 }
  0x3f   : > { %3161 = vmatprep.subr.bf16.mxu0 %v3820_v13  ;;  %3153 = vmatpush3.bf16.msra.mxu1 %v4040_v27 }
  0x40   : > { %3154 = vmatprep.subr.bf16.mxu1 %v3718_v49  ;;  %2848 = vmatprep.mubr.msk.f32.mxu1 %vm3719_vm1, %v3717_v6 }
  0x41   : > { %670 = vmatmul.mubr.f32.vlgmr.msra.gmra.mrb[0].mxu0 %v4044_v28 }
  0x42   : > { %3163 = vmatpush1.bf16.msra.mxu0 %v3828_v16  ;;  %906 = vmatprep.mubr.f32.mxu0 %v3717_v6 }
  0x43   : > { %3165 = vmatprep.subr.bf16.mxu0 %v3831_v17  ;;  %3156 = vmatpush3.bf16.msra.mxu1 %v4058_v31 }
  0x44   : > { %3157 = vmatprep.subr.bf16.mxu1 %v3718_v49 }
  0x46   : > { %3167 = vmatpush1.bf16.msra.mxu0 %v3849_v23 }
  0x47   : > { %3169 = vmatprep.subr.bf16.mxu0 %v3852_v24  ;;  %3159 = vmatpush3.bf16.msra.mxu1 %v4073_v36 }
  0x48   : > { %3192 = vmatprep.subr.bf16.mxu1 %v3718_v49 }
  0x4a   : > { %3171 = vmatpush1.bf16.msra.mxu0 %v3876_v32  ;;  %2849 = vmatmul.mubr.f32.vlgmr.msra.gmra.mrb[8].mxu1 %v4044_v28 }
  0x4b   : > { %3173 = vmatprep.subr.bf16.mxu0 %v3879_v34  ;;  %3194 = vmatpush3.bf16.msra.mxu1 %v3900_v41 }
  0x4c   : > { %2883 = vmatprep.mubr.msk.f32.mxu1 %vm3719_vm1, %v3717_v6  ;;  %3195 = vmatprep.subr.bf16.mxu1 %v3718_v49 }
  0x4e   : > { %3175 = vmatpush1.bf16.msra.mxu0 %v3905_v43 }
  0x4f   : > { %3177 = vmatprep.subr.bf16.mxu0 %v3914_v46  ;;  %3197 = vmatpush3.bf16.msra.mxu1 %v3932_v52 }
  0x50   : > { %3198 = vmatprep.subr.bf16.mxu1 %v3718_v49 }
  0x52   : > { %3179 = vmatpush1.bf16.msra.mxu0 %v3937_v54 }
  0x53   : > { %3181 = vmatprep.subr.bf16.mxu0 %v3946_v57  ;;  %3200 = vmatpush3.bf16.msra.mxu1 %v3964_v62 }
  0x54   : > { %3201 = vmatprep.subr.bf16.mxu1 %v3718_v49 }
  0x56   : > { %3183 = vmatpush1.bf16.msra.mxu0 %v3969_v0 }
  0x57   : > { %3185 = vmatprep.subr.bf16.mxu0 %v3978_v3  ;;  %3203 = vmatpush3.bf16.msra.mxu1 %v3996_v9 }
  0x58   : > { %3204 = vmatprep.subr.bf16.mxu1 %v3718_v49 }
  0x5a   : > { %3187 = vmatpush1.bf16.msra.mxu0 %v4001_v11 }
  0x5b   : > { %3189 = vmatprep.subr.bf16.mxu0 %v4010_v15  ;;  %3206 = vmatpush3.bf16.msra.mxu1 %v4022_v20 }
  0x5c   : > { %3207 = vmatprep.subr.bf16.mxu1 %v3718_v49 }
  0x5e   : > { %3191 = vmatpush1.bf16.msra.mxu0 %v4027_v22 }
  0x5f   : > { %3217 = vmatprep.subr.bf16.mxu0 %v3820_v13  ;;  %3209 = vmatpush3.bf16.msra.mxu1 %v4040_v27 }
  0x60   : > { %3210 = vmatprep.subr.bf16.mxu1 %v3718_v49 }
  0x63   : > { %3212 = vmatpush3.bf16.msra.mxu1 %v4058_v31 }
  0x64   : > { %3213 = vmatprep.subr.bf16.mxu1 %v3718_v49 }
  0x67   : > { %3215 = vmatpush3.bf16.msra.mxu1 %v4073_v36 }
  0x68   : > { %3248 = vmatprep.subr.bf16.mxu1 %v3718_v49 }
  0xfb   : > { %v2806_v44 = vpop.f32.mrb[0].mxu1 }
  0xfc   : > { %v4114_v45 = vadd.f32 %v2806_v44, %v281_v42  ;;  %v489_v47 = vpop.f32.mrb[1].mxu1 }
  0xfd   : > { %v490_v39 = vadd.f32 %v489_v47, %v281_v42 }
 0x103   : > { %v2809_v48 = vpop.f32.mrb[2].mxu1 }
 0x104   : > { %v4116_v50 = vadd.f32 %v2809_v48, %v281_v42  ;;  %v499_v51 = vpop.f32.mrb[3].mxu1 }
 0x105   : > { %v4118_v53 = vadd.f32 %v499_v51, %v281_v42  ;;  %v3720_v51 = vmov 1966171168  }
 0x106   : > { %v776_v55 = vunpack.c.l.s4 %v3720_v51 }
 0x10b   : > { %v2812_v56 = vpop.f32.mrb[4].mxu1 }
 0x10c   : > { %v4120_v58 = vadd.f32 %v2812_v56, %v281_v42  ;;  %v509_v59 = vpop.f32.mrb[5].mxu1  ;;  %v777_v56 = vunpack.c.0.s8 %v776_v55 }
 0x10d   : > { %v4124_v61 = vadd.f32 %v509_v59, %v281_v42 }
 0x110   : > { %v2815_v63 = vpop.f32.mrb[6].mxu1 }
 0x111   : > { %v4126_v2 = vadd.f32 %v2815_v63, %v281_v42  ;;  %v519_v4 = vpop.f32.mrb[7].mxu1 }
 0x112   : > { %v4129_v10 = vadd.f32 %v519_v4, %v281_v42  ;;  %v4141_v4 = vsub.s32 %v777_v56, %v271_v38 }
 0x114   : > { %v671_v1 = vpop.f32.mrb[0].mxu0 }
 0x115   : > { %v3552_v5 = vadd.f32 %v671_v1, %v4122_v60  ;;  %v673_v8 = vpop.f32.mrb[1].mxu0 }
 0x116   : > { %v3553_v18 = vadd.f32 %v673_v8, %v4131_v14 }
 0x117   : > { %v2601_v12 = vmul.f32 -1.442695, %v3552_v5 }
 0x118   : > { %v2602_v25 = vmul.f32 -1.442695, %v3553_v18 }
 0x119   : > { %3612 = vpow2.f32 %v2601_v12 }
 0x11a   : > { %3614 = vpow2.f32 %v2602_v25 }
 0x11d   : > { %v742_v19 = vpop.f32.mrb[8].mxu1 }
 0x11e   : > { %v2850_v21 = vpop.f32.mrb[9].mxu1  ;;  %v766_v33 = vadd.f32 %v4137_v30, %v742_v19 }
 0x123   : > { %v3613_v26 = vpop.eup %3612 }
 0x124   : > { %v750_v29 = vadd.f32 1.0, %v3613_v26  ;;  %v3615_v35 = vpop.eup %3614 }
 0x125   : > { %v757_v44 = vadd.f32 1.0, %v3615_v35 }
 0x126   : > { %3616 = vrcp.f32 %v750_v29 }
 0x130   : > { %v3617_v37 = vpop.eup %3616 }
 0x131   : > { %v767_v40 = vmul.f32 %v3617_v37, %v766_v33 }
 0x133   : > { %v768_v48 = vadd.f32 %v767_v40, %v490_v39 }
 0x135   : > { %3618 = vtanh.f32 %v768_v48 }
 0x136   : > { %3620 = vrcp.f32 %v757_v44 }
 0x13f   : > { %v3619_v59 = vpop.eup %3618 }
 0x140   : > { %v770_v63 = vsub.f32 %v4044_v28, %v3619_v59  ;;  %v3621_v1 = vpop.eup %3620 }
 0x142   : > { %v771_v5 = vmul.f32 %v3621_v1, %v770_v63 }
 0x144   : > { %v4143_v7 = vadd.f32 %v3619_v59, %v771_v5 }
 0x146   : > { %v774_v42 = vcombine.high %v4143_v7, %v4143_v7  ;;  %v781_v47 = vrot.slane %v4143_v7, %v4141_v4  ;;  %907 = vmatmul.mubr.f32.vlgmr.msra.gmra.mrb[2].mxu0 %v4143_v7  ;;  %2884 = vmatmul.mubr.f32.vlgmr.msra.gmra.mrb[10].mxu1 %v4143_v7 }
 0x147   : > { %3219 = vmatpush1.bf16.msra.mxu0 %v3828_v16  ;;  %3250 = vmatpush3.bf16.msra.mxu1 %v3900_v41 }
 0x148   : > { %v788_v28 = vrot.slane %v774_v42, %v4141_v4  ;;  %v789_v38 = vcombine.high %v781_v47, %v781_v47  ;;  %v797_v8 = vrot.slane %v781_v47, %v4141_v4  ;;  %2604 = vst.sshfl [vmem:[%s3788_s14] sm:$0x1 pattern:$0x73625140] %v781_v47  ;;  %3221 = vmatprep.subr.bf16.mxu0 %v3831_v17 }
 0x149   : > { %3251 = vmatprep.subr.bf16.mxu1 %v3718_v49  ;;  %1137 = vmatprep.mubr.f32.mxu0 %v3717_v6 }
 0x14a   : > { %2918 = vmatprep.mubr.msk.f32.mxu1 %vm3719_vm1, %v3717_v6  ;;  %v790_v12 = vcombine.high %v788_v28, %v788_v28  ;;  %v804_v18 = vrot.slane %v788_v28, %v4141_v4  ;;  %v811_v19 = vrot.slane %v789_v38, %v4141_v4  ;;  %v819_v21 = vcombine.high %v797_v8, %v797_v8 }
 0x14b   : > { %2605 = vst.sshfl [vmem:[%s3788_s14 + $0x8] sm:$0x1 pattern:$0x73625140] %v789_v38  ;;  %3223 = vmatpush1.bf16.msra.mxu0 %v3849_v23  ;;  %3253 = vmatpush3.bf16.msra.mxu1 %v3932_v52 }
 0x14c   : > { %2606 = vst.sshfl [vmem:[%s3788_s14 + $0x20] sm:$0x1 pattern:$0x73625140] %v788_v28  ;;  %v818_v25 = vrot.slane %v790_v12, %v4141_v4  ;;  %v820_v26 = vcombine.high %v804_v18, %v804_v18  ;;  %v821_v29 = vcombine.high %v811_v19, %v811_v19  ;;  %833 = vst [vmem:[%s3788_s14 + $0x10] sm:$0x1] %v819_v21  ;;  %3225 = vmatprep.subr.bf16.mxu0 %v3852_v24 }
 0x14d   : > { %2607 = vst.sshfl [vmem:[%s3788_s14 + $0x28] sm:$0x1 pattern:$0x73625140] %v790_v12  ;;  %3254 = vmatprep.subr.bf16.mxu1 %v3718_v49 }
 0x14e   : > { %v822_v33 = vcombine.high %v818_v25, %v818_v25  ;;  %834 = vst [vmem:[%s3788_s14 + $0x18] sm:$0x1] %v821_v29  ;;  %837 = vst [vmem:[%s3788_s14 + $0x30] sm:$0x1] %v820_v26 }
 0x14f   : > { %3227 = vmatpush1.bf16.msra.mxu0 %v3876_v32  ;;  %3256 = vmatpush3.bf16.msra.mxu1 %v3964_v62 }
 0x150   : > { %838 = vst [vmem:[%s3788_s14 + $0x38] sm:$0x1] %v822_v33  ;;  %3229 = vmatprep.subr.bf16.mxu0 %v3879_v34  ;;  %3257 = vmatprep.subr.bf16.mxu1 %v3718_v49 }
 0x153   : > { %3231 = vmatpush1.bf16.msra.mxu0 %v3905_v43  ;;  %3259 = vmatpush3.bf16.msra.mxu1 %v3996_v9 }
 0x154   : > { %3233 = vmatprep.subr.bf16.mxu0 %v3914_v46  ;;  %3260 = vmatprep.subr.bf16.mxu1 %v3718_v49 }
 0x157   : > { %3235 = vmatpush1.bf16.msra.mxu0 %v3937_v54  ;;  %3262 = vmatpush3.bf16.msra.mxu1 %v4022_v20 }
 0x158   : > { %3237 = vmatprep.subr.bf16.mxu0 %v3946_v57  ;;  %3263 = vmatprep.subr.bf16.mxu1 %v3718_v49 }
 0x15b   : > { %3239 = vmatpush1.bf16.msra.mxu0 %v3969_v0  ;;  %3265 = vmatpush3.bf16.msra.mxu1 %v4040_v27 }
 0x15c   : > { %3241 = vmatprep.subr.bf16.mxu0 %v3978_v3  ;;  %3266 = vmatprep.subr.bf16.mxu1 %v3718_v49 }
 0x15f   : > { %3243 = vmatpush1.bf16.msra.mxu0 %v4001_v11  ;;  %3268 = vmatpush3.bf16.msra.mxu1 %v4058_v31 }
 0x160   : > { %3245 = vmatprep.subr.bf16.mxu0 %v4010_v15  ;;  %3269 = vmatprep.subr.bf16.mxu1 %v3718_v49 }
 0x163   : > { %3247 = vmatpush1.bf16.msra.mxu0 %v4027_v22  ;;  %3271 = vmatpush3.bf16.msra.mxu1 %v4073_v36 }
 0x164   : > { %3273 = vmatprep.subr.bf16.mxu0 %v3820_v13  ;;  %3304 = vmatprep.subr.bf16.mxu1 %v3718_v49 }
 0x219   : > { %v908_v35 = vpop.f32.mrb[2].mxu0  ;;  %v979_v37 = vpop.f32.mrb[10].mxu1 }
 0x21a   : > { %v3554_v39 = vadd.f32 %v908_v35, %v4122_v60  ;;  %v910_v40 = vpop.f32.mrb[3].mxu0  ;;  %v2885_v44 = vpop.f32.mrb[11].mxu1  ;;  %v997_v1 = vadd.f32 %v4137_v30, %v979_v37 }
 0x21b   : > { %v3555_v51 = vadd.f32 %v910_v40, %v4131_v14 }
 0x21c   : > { %v2608_v48 = vmul.f32 -1.442695, %v3554_v39 }
 0x21d   : > { %v2609_v55 = vmul.f32 -1.442695, %v3555_v51 }
 0x21e   : > { %3622 = vpow2.f32 %v2608_v48 }
 0x21f   : > { %3624 = vpow2.f32 %v2609_v55 }
 0x228   : > { %v3623_v56 = vpop.eup %3622 }
 0x229   : > { %v987_v59 = vadd.f32 1.0, %v3623_v56  ;;  %v3625_v63 = vpop.eup %3624 }
 0x22a   : > { %v994_v28 = vadd.f32 1.0, %v3625_v63 }
 0x22b   : > { %3626 = vrcp.f32 %v987_v59 }
 0x235   : > { %v3627_v5 = vpop.eup %3626 }
 0x236   : > { %v998_v42 = vmul.f32 %v3627_v5, %v997_v1 }
 0x238   : > { %v999_v47 = vadd.f32 %v998_v42, %v4114_v45 }
 0x23a   : > { %3628 = vtanh.f32 %v999_v47 }
 0x23b   : > { %3630 = vrcp.f32 %v994_v28 }
 0x244   : > { %v3629_v38 = vpop.eup %3628 }
 0x245   : > { %v1001_v8 = vsub.f32 %v4143_v7, %v3629_v38  ;;  %v3631_v12 = vpop.eup %3630 }
 0x247   : > { %v1002_v18 = vmul.f32 %v3631_v12, %v1001_v8 }
 0x249   : > { %v4204_v19 = vadd.f32 %v3629_v38, %v1002_v18 }
 0x24b   : > { %v1005_v21 = vcombine.high %v4204_v19, %v4204_v19  ;;  %v1012_v25 = vrot.slane %v4204_v19, %v4141_v4  ;;  %1138 = vmatmul.mubr.f32.vlgmr.msra.gmra.mrb[4].mxu0 %v4204_v19  ;;  %2919 = vmatmul.mubr.f32.vlgmr.msra.gmra.mrb[12].mxu1 %v4204_v19 }
 0x24c   : > { %3275 = vmatpush1.bf16.msra.mxu0 %v3828_v16  ;;  %3306 = vmatpush3.bf16.msra.mxu1 %v3900_v41 }
 0x24d   : > { %v1019_v45 = vrot.slane %v1005_v21, %v4141_v4  ;;  %v1020_v7 = vcombine.high %v1012_v25, %v1012_v25  ;;  %v1028_v26 = vrot.slane %v1012_v25, %v4141_v4  ;;  %2610 = vst.sshfl [vmem:[%s3788_s14 + $0x1] sm:$0x1 pattern:$0x73625140] %v1012_v25  ;;  %3277 = vmatprep.subr.bf16.mxu0 %v3831_v17 }
 0x24e   : > { %3307 = vmatprep.subr.bf16.mxu1 %v3718_v49  ;;  %1368 = vmatprep.mubr.f32.mxu0 %v3717_v6 }
 0x24f   : > { %2953 = vmatprep.mubr.msk.f32.mxu1 %vm3719_vm1, %v3717_v6  ;;  %v1021_v29 = vcombine.high %v1019_v45, %v1019_v45  ;;  %v1035_v33 = vrot.slane %v1019_v45, %v4141_v4  ;;  %v1042_v35 = vrot.slane %v1020_v7, %v4141_v4  ;;  %v1050_v37 = vcombine.high %v1028_v26, %v1028_v26 }
 0x250   : > { %2611 = vst.sshfl [vmem:[%s3788_s14 + $0x9] sm:$0x1 pattern:$0x73625140] %v1020_v7  ;;  %3279 = vmatpush1.bf16.msra.mxu0 %v3849_v23  ;;  %3309 = vmatpush3.bf16.msra.mxu1 %v3932_v52 }
 0x251   : > { %2612 = vst.sshfl [vmem:[%s3788_s14 + $0x21] sm:$0x1 pattern:$0x73625140] %v1019_v45  ;;  %v1049_v39 = vrot.slane %v1021_v29, %v4141_v4  ;;  %v1051_v40 = vcombine.high %v1035_v33, %v1035_v33  ;;  %v1052_v44 = vcombine.high %v1042_v35, %v1042_v35  ;;  %1064 = vst [vmem:[%s3788_s14 + $0x11] sm:$0x1] %v1050_v37  ;;  %3281 = vmatprep.subr.bf16.mxu0 %v3852_v24 }
 0x252   : > { %2613 = vst.sshfl [vmem:[%s3788_s14 + $0x29] sm:$0x1 pattern:$0x73625140] %v1021_v29  ;;  %3310 = vmatprep.subr.bf16.mxu1 %v3718_v49 }
 0x253   : > { %v1053_v48 = vcombine.high %v1049_v39, %v1049_v39  ;;  %1065 = vst [vmem:[%s3788_s14 + $0x19] sm:$0x1] %v1052_v44  ;;  %1068 = vst [vmem:[%s3788_s14 + $0x31] sm:$0x1] %v1051_v40 }
 0x254   : > { %3283 = vmatpush1.bf16.msra.mxu0 %v3876_v32  ;;  %3312 = vmatpush3.bf16.msra.mxu1 %v3964_v62 }
 0x255   : > { %1069 = vst [vmem:[%s3788_s14 + $0x39] sm:$0x1] %v1053_v48  ;;  %3285 = vmatprep.subr.bf16.mxu0 %v3879_v34  ;;  %3313 = vmatprep.subr.bf16.mxu1 %v3718_v49 }
 0x258   : > { %3287 = vmatpush1.bf16.msra.mxu0 %v3905_v43  ;;  %3315 = vmatpush3.bf16.msra.mxu1 %v3996_v9 }
 0x259   : > { %3289 = vmatprep.subr.bf16.mxu0 %v3914_v46  ;;  %3316 = vmatprep.subr.bf16.mxu1 %v3718_v49 }
 0x25c   : > { %3291 = vmatpush1.bf16.msra.mxu0 %v3937_v54  ;;  %3318 = vmatpush3.bf16.msra.mxu1 %v4022_v20 }
 0x25d   : > { %3293 = vmatprep.subr.bf16.mxu0 %v3946_v57  ;;  %3319 = vmatprep.subr.bf16.mxu1 %v3718_v49 }
 0x260   : > { %3295 = vmatpush1.bf16.msra.mxu0 %v3969_v0  ;;  %3321 = vmatpush3.bf16.msra.mxu1 %v4040_v27 }
 0x261   : > { %3297 = vmatprep.subr.bf16.mxu0 %v3978_v3  ;;  %3322 = vmatprep.subr.bf16.mxu1 %v3718_v49 }
 0x264   : > { %3299 = vmatpush1.bf16.msra.mxu0 %v4001_v11  ;;  %3324 = vmatpush3.bf16.msra.mxu1 %v4058_v31 }
 0x265   : > { %3301 = vmatprep.subr.bf16.mxu0 %v4010_v15  ;;  %3325 = vmatprep.subr.bf16.mxu1 %v3718_v49 }
 0x268   : > { %3303 = vmatpush1.bf16.msra.mxu0 %v4027_v22  ;;  %3327 = vmatpush3.bf16.msra.mxu1 %v4073_v36 }
 0x269   : > { %3329 = vmatprep.subr.bf16.mxu0 %v3820_v13  ;;  %3360 = vmatprep.subr.bf16.mxu1 %v3718_v49 }
 0x31e   : > { %v1139_v51 = vpop.f32.mrb[4].mxu0  ;;  %v1210_v55 = vpop.f32.mrb[12].mxu1 }
 0x31f   : > { %v3556_v56 = vadd.f32 %v1139_v51, %v4122_v60  ;;  %v1141_v59 = vpop.f32.mrb[5].mxu0  ;;  %v2920_v63 = vpop.f32.mrb[13].mxu1  ;;  %v1228_v8 = vadd.f32 %v4137_v30, %v1210_v55 }
 0x320   : > { %v3557_v5 = vadd.f32 %v1141_v59, %v4131_v14 }
 0x321   : > { %v2614_v1 = vmul.f32 -1.442695, %v3556_v56 }
 0x322   : > { %v2615_v42 = vmul.f32 -1.442695, %v3557_v5 }
 0x323   : > { %3632 = vpow2.f32 %v2614_v1 }
 0x324   : > { %3634 = vpow2.f32 %v2615_v42 }
 0x32d   : > { %v3633_v47 = vpop.eup %3632 }
 0x32e   : > { %v1218_v28 = vadd.f32 1.0, %v3633_v47  ;;  %v3635_v38 = vpop.eup %3634 }
 0x32f   : > { %v1225_v25 = vadd.f32 1.0, %v3635_v38 }
 0x330   : > { %3636 = vrcp.f32 %v1218_v28 }
 0x33a   : > { %v3637_v12 = vpop.eup %3636 }
 0x33b   : > { %v1229_v18 = vmul.f32 %v3637_v12, %v1228_v8 }
 0x33d   : > { %v1230_v21 = vadd.f32 %v1229_v18, %v4118_v53 }
 0x33f   : > { %3638 = vtanh.f32 %v1230_v21 }
 0x340   : > { %3640 = vrcp.f32 %v1225_v25 }
 0x349   : > { %v3639_v45 = vpop.eup %3638 }
 0x34a   : > { %v1232_v7 = vsub.f32 %v4204_v19, %v3639_v45  ;;  %v3641_v26 = vpop.eup %3640 }
 0x34c   : > { %v1233_v29 = vmul.f32 %v3641_v26, %v1232_v7 }
 0x34e   : > { %v4265_v33 = vadd.f32 %v3639_v45, %v1233_v29 }
 0x350   : > { %v1236_v35 = vcombine.high %v4265_v33, %v4265_v33  ;;  %v1243_v37 = vrot.slane %v4265_v33, %v4141_v4  ;;  %1369 = vmatmul.mubr.f32.vlgmr.msra.gmra.mrb[6].mxu0 %v4265_v33  ;;  %2954 = vmatmul.mubr.f32.vlgmr.msra.gmra.mrb[14].mxu1 %v4265_v33 }
 0x351   : > { %3331 = vmatpush1.bf16.msra.mxu0 %v3828_v16  ;;  %3362 = vmatpush3.bf16.msra.mxu1 %v3900_v41 }
 0x352   : > { %v1250_v53 = vrot.slane %v1236_v35, %v4141_v4  ;;  %v1251_v19 = vcombine.high %v1243_v37, %v1243_v37  ;;  %v1259_v39 = vrot.slane %v1243_v37, %v4141_v4  ;;  %2616 = vst.sshfl [vmem:[%s3788_s14 + $0x2] sm:$0x1 pattern:$0x73625140] %v1243_v37  ;;  %3333 = vmatprep.subr.bf16.mxu0 %v3831_v17 }
 0x353   : > { %3363 = vmatprep.subr.bf16.mxu1 %v3718_v49  ;;  %1599 = vmatprep.mubr.f32.mxu0 %v3717_v6 }
 0x354   : > { %2988 = vmatprep.mubr.msk.f32.mxu1 %vm3719_vm1, %v3717_v6  ;;  %v1252_v40 = vcombine.high %v1250_v53, %v1250_v53  ;;  %v1266_v44 = vrot.slane %v1250_v53, %v4141_v4  ;;  %v1273_v48 = vrot.slane %v1251_v19, %v4141_v4  ;;  %v1281_v51 = vcombine.high %v1259_v39, %v1259_v39 }
 0x355   : > { %2617 = vst.sshfl [vmem:[%s3788_s14 + $0xa] sm:$0x1 pattern:$0x73625140] %v1251_v19  ;;  %3335 = vmatpush1.bf16.msra.mxu0 %v3849_v23  ;;  %3365 = vmatpush3.bf16.msra.mxu1 %v3932_v52 }
 0x356   : > { %2618 = vst.sshfl [vmem:[%s3788_s14 + $0x22] sm:$0x1 pattern:$0x73625140] %v1250_v53  ;;  %v1280_v55 = vrot.slane %v1252_v40, %v4141_v4  ;;  %v1282_v56 = vcombine.high %v1266_v44, %v1266_v44  ;;  %v1283_v59 = vcombine.high %v1273_v48, %v1273_v48  ;;  %1295 = vst [vmem:[%s3788_s14 + $0x12] sm:$0x1] %v1281_v51  ;;  %3337 = vmatprep.subr.bf16.mxu0 %v3852_v24 }
 0x357   : > { %2619 = vst.sshfl [vmem:[%s3788_s14 + $0x2a] sm:$0x1 pattern:$0x73625140] %v1252_v40  ;;  %3366 = vmatprep.subr.bf16.mxu1 %v3718_v49 }
 0x358   : > { %v1284_v63 = vcombine.high %v1280_v55, %v1280_v55  ;;  %1296 = vst [vmem:[%s3788_s14 + $0x1a] sm:$0x1] %v1283_v59  ;;  %1299 = vst [vmem:[%s3788_s14 + $0x32] sm:$0x1] %v1282_v56 }
 0x359   : > { %3339 = vmatpush1.bf16.msra.mxu0 %v3876_v32  ;;  %3368 = vmatpush3.bf16.msra.mxu1 %v3964_v62 }
 0x35a   : > { %1300 = vst [vmem:[%s3788_s14 + $0x3a] sm:$0x1] %v1284_v63  ;;  %3341 = vmatprep.subr.bf16.mxu0 %v3879_v34  ;;  %3369 = vmatprep.subr.bf16.mxu1 %v3718_v49 }
 0x35d   : > { %3343 = vmatpush1.bf16.msra.mxu0 %v3905_v43  ;;  %3371 = vmatpush3.bf16.msra.mxu1 %v3996_v9 }
 0x35e   : > { %3345 = vmatprep.subr.bf16.mxu0 %v3914_v46  ;;  %3372 = vmatprep.subr.bf16.mxu1 %v3718_v49 }
 0x361   : > { %3347 = vmatpush1.bf16.msra.mxu0 %v3937_v54  ;;  %3374 = vmatpush3.bf16.msra.mxu1 %v4022_v20 }
 0x362   : > { %3349 = vmatprep.subr.bf16.mxu0 %v3946_v57  ;;  %3375 = vmatprep.subr.bf16.mxu1 %v3718_v49 }
 0x365   : > { %3351 = vmatpush1.bf16.msra.mxu0 %v3969_v0  ;;  %3377 = vmatpush3.bf16.msra.mxu1 %v4040_v27 }
 0x366   : > { %3353 = vmatprep.subr.bf16.mxu0 %v3978_v3  ;;  %3378 = vmatprep.subr.bf16.mxu1 %v3718_v49 }
 0x369   : > { %3355 = vmatpush1.bf16.msra.mxu0 %v4001_v11  ;;  %3380 = vmatpush3.bf16.msra.mxu1 %v4058_v31 }
 0x36a   : > { %3357 = vmatprep.subr.bf16.mxu0 %v4010_v15  ;;  %3381 = vmatprep.subr.bf16.mxu1 %v3718_v49 }
 0x36d   : > { %3359 = vmatpush1.bf16.msra.mxu0 %v4027_v22  ;;  %3383 = vmatpush3.bf16.msra.mxu1 %v4073_v36 }
 0x36e   : > { %3385 = vmatprep.subr.bf16.mxu0 %v3820_v13  ;;  %3416 = vmatprep.subr.bf16.mxu1 %v3718_v49 }
 0x423   : > { %v1370_v1 = vpop.f32.mrb[6].mxu0  ;;  %v1441_v5 = vpop.f32.mrb[14].mxu1 }
 0x424   : > { %v3558_v42 = vadd.f32 %v1370_v1, %v4122_v60  ;;  %v1372_v47 = vpop.f32.mrb[7].mxu0  ;;  %v2955_v28 = vpop.f32.mrb[15].mxu1  ;;  %v1459_v45 = vadd.f32 %v4137_v30, %v1441_v5 }
 0x425   : > { %v3559_v8 = vadd.f32 %v1372_v47, %v4131_v14 }
 0x426   : > { %v2620_v38 = vmul.f32 -1.442695, %v3558_v42 }
 0x427   : > { %v2621_v12 = vmul.f32 -1.442695, %v3559_v8 }
 0x428   : > { %3642 = vpow2.f32 %v2620_v38 }
 0x429   : > { %3644 = vpow2.f32 %v2621_v12 }
 0x432   : > { %v3643_v18 = vpop.eup %3642 }
 0x433   : > { %v1449_v21 = vadd.f32 1.0, %v3643_v18  ;;  %v3645_v25 = vpop.eup %3644 }
 0x434   : > { %v1456_v35 = vadd.f32 1.0, %v3645_v25 }
 0x435   : > { %3646 = vrcp.f32 %v1449_v21 }
 0x43f   : > { %v3647_v7 = vpop.eup %3646 }
 0x440   : > { %v1460_v26 = vmul.f32 %v3647_v7, %v1459_v45 }
 0x442   : > { %v1461_v29 = vadd.f32 %v1460_v26, %v4116_v50 }
 0x444   : > { %3648 = vtanh.f32 %v1461_v29 }
 0x445   : > { %3650 = vrcp.f32 %v1456_v35 }
 0x44e   : > { %v3649_v37 = vpop.eup %3648 }
 0x44f   : > { %v1463_v53 = vsub.f32 %v4265_v33, %v3649_v37  ;;  %v3651_v19 = vpop.eup %3650 }
 0x451   : > { %v1464_v39 = vmul.f32 %v3651_v19, %v1463_v53 }
 0x453   : > { %v4326_v40 = vadd.f32 %v3649_v37, %v1464_v39 }
 0x455   : > { %v1467_v44 = vcombine.high %v4326_v40, %v4326_v40  ;;  %v1474_v48 = vrot.slane %v4326_v40, %v4141_v4  ;;  %1600 = vmatmul.mubr.f32.vlgmr.msra.gmra.mrb[8].mxu0 %v4326_v40  ;;  %2989 = vmatmul.mubr.f32.vlgmr.msra.gmra.mrb[16].mxu1 %v4326_v40 }
 0x456   : > { %3387 = vmatpush1.bf16.msra.mxu0 %v3828_v16  ;;  %3418 = vmatpush3.bf16.msra.mxu1 %v3900_v41 }
 0x457   : > { %v1481_v50 = vrot.slane %v1467_v44, %v4141_v4  ;;  %v1482_v33 = vcombine.high %v1474_v48, %v1474_v48  ;;  %v1490_v51 = vrot.slane %v1474_v48, %v4141_v4  ;;  %2622 = vst.sshfl [vmem:[%s3788_s14 + $0x3] sm:$0x1 pattern:$0x73625140] %v1474_v48  ;;  %3389 = vmatprep.subr.bf16.mxu0 %v3831_v17 }
 0x458   : > { %3419 = vmatprep.subr.bf16.mxu1 %v3718_v49  ;;  %1830 = vmatprep.mubr.f32.mxu0 %v3717_v6 }
 0x459   : > { %3023 = vmatprep.mubr.msk.f32.mxu1 %vm3719_vm1, %v3717_v6  ;;  %v1483_v55 = vcombine.high %v1481_v50, %v1481_v50  ;;  %v1497_v56 = vrot.slane %v1481_v50, %v4141_v4  ;;  %v1504_v59 = vrot.slane %v1482_v33, %v4141_v4  ;;  %v1512_v63 = vcombine.high %v1490_v51, %v1490_v51 }
 0x45a   : > { %2623 = vst.sshfl [vmem:[%s3788_s14 + $0xb] sm:$0x1 pattern:$0x73625140] %v1482_v33  ;;  %3391 = vmatpush1.bf16.msra.mxu0 %v3849_v23  ;;  %3421 = vmatpush3.bf16.msra.mxu1 %v3932_v52 }
 0x45b   : > { %2624 = vst.sshfl [vmem:[%s3788_s14 + $0x23] sm:$0x1 pattern:$0x73625140] %v1481_v50  ;;  %v1511_v1 = vrot.slane %v1483_v55, %v4141_v4  ;;  %v1513_v5 = vcombine.high %v1497_v56, %v1497_v56  ;;  %v1514_v42 = vcombine.high %v1504_v59, %v1504_v59  ;;  %1526 = vst [vmem:[%s3788_s14 + $0x13] sm:$0x1] %v1512_v63  ;;  %3393 = vmatprep.subr.bf16.mxu0 %v3852_v24 }
 0x45c   : > { %2625 = vst.sshfl [vmem:[%s3788_s14 + $0x2b] sm:$0x1 pattern:$0x73625140] %v1483_v55  ;;  %3422 = vmatprep.subr.bf16.mxu1 %v3718_v49 }
 0x45d   : > { %v1515_v47 = vcombine.high %v1511_v1, %v1511_v1  ;;  %1527 = vst [vmem:[%s3788_s14 + $0x1b] sm:$0x1] %v1514_v42  ;;  %1530 = vst [vmem:[%s3788_s14 + $0x33] sm:$0x1] %v1513_v5 }
 0x45e   : > { %3395 = vmatpush1.bf16.msra.mxu0 %v3876_v32  ;;  %3424 = vmatpush3.bf16.msra.mxu1 %v3964_v62 }
 0x45f   : > { %1531 = vst [vmem:[%s3788_s14 + $0x3b] sm:$0x1] %v1515_v47  ;;  %3397 = vmatprep.subr.bf16.mxu0 %v3879_v34  ;;  %3425 = vmatprep.subr.bf16.mxu1 %v3718_v49 }
 0x462   : > { %3399 = vmatpush1.bf16.msra.mxu0 %v3905_v43  ;;  %3427 = vmatpush3.bf16.msra.mxu1 %v3996_v9 }
 0x463   : > { %3401 = vmatprep.subr.bf16.mxu0 %v3914_v46  ;;  %3428 = vmatprep.subr.bf16.mxu1 %v3718_v49 }
 0x466   : > { %3403 = vmatpush1.bf16.msra.mxu0 %v3937_v54  ;;  %3430 = vmatpush3.bf16.msra.mxu1 %v4022_v20 }
 0x467   : > { %3405 = vmatprep.subr.bf16.mxu0 %v3946_v57  ;;  %3431 = vmatprep.subr.bf16.mxu1 %v3718_v49 }
 0x46a   : > { %3407 = vmatpush1.bf16.msra.mxu0 %v3969_v0  ;;  %3433 = vmatpush3.bf16.msra.mxu1 %v4040_v27 }
 0x46b   : > { %3409 = vmatprep.subr.bf16.mxu0 %v3978_v3  ;;  %3434 = vmatprep.subr.bf16.mxu1 %v3718_v49 }
 0x46e   : > { %3411 = vmatpush1.bf16.msra.mxu0 %v4001_v11  ;;  %3436 = vmatpush3.bf16.msra.mxu1 %v4058_v31 }
 0x46f   : > { %3413 = vmatprep.subr.bf16.mxu0 %v4010_v15  ;;  %3437 = vmatprep.subr.bf16.mxu1 %v3718_v49 }
 0x472   : > { %3415 = vmatpush1.bf16.msra.mxu0 %v4027_v22  ;;  %3439 = vmatpush3.bf16.msra.mxu1 %v4073_v36 }
 0x473   : > { %3441 = vmatprep.subr.bf16.mxu0 %v3820_v13  ;;  %3472 = vmatprep.subr.bf16.mxu1 %v3718_v49 }
 0x528   : > { %v1601_v28 = vpop.f32.mrb[8].mxu0  ;;  %v1672_v38 = vpop.f32.mrb[16].mxu1 }
 0x529   : > { %v3560_v8 = vadd.f32 %v1601_v28, %v4122_v60  ;;  %v1603_v12 = vpop.f32.mrb[9].mxu0  ;;  %v2990_v18 = vpop.f32.mrb[17].mxu1  ;;  %v1690_v35 = vadd.f32 %v4137_v30, %v1672_v38 }
 0x52a   : > { %v3561_v25 = vadd.f32 %v1603_v12, %v4131_v14 }
 0x52b   : > { %v2626_v21 = vmul.f32 -1.442695, %v3560_v8 }
 0x52c   : > { %v2627_v45 = vmul.f32 -1.442695, %v3561_v25 }
 0x52d   : > { %3652 = vpow2.f32 %v2626_v21 }
 0x52e   : > { %3654 = vpow2.f32 %v2627_v45 }
 0x537   : > { %v3653_v7 = vpop.eup %3652 }
 0x538   : > { %v1680_v26 = vadd.f32 1.0, %v3653_v7  ;;  %v3655_v29 = vpop.eup %3654 }
 0x539   : > { %v1687_v39 = vadd.f32 1.0, %v3655_v29 }
 0x53a   : > { %3656 = vrcp.f32 %v1680_v26 }
 0x544   : > { %v3657_v37 = vpop.eup %3656 }
 0x545   : > { %v1691_v53 = vmul.f32 %v3657_v37, %v1690_v35 }
 0x547   : > { %v1692_v19 = vadd.f32 %v1691_v53, %v4124_v61 }
 0x549   : > { %3658 = vtanh.f32 %v1692_v19 }
 0x54a   : > { %3660 = vrcp.f32 %v1687_v39 }
 0x553   : > { %v3659_v44 = vpop.eup %3658 }
 0x554   : > { %v1694_v48 = vsub.f32 %v4326_v40, %v3659_v44  ;;  %v3661_v50 = vpop.eup %3660 }
 0x556   : > { %v1695_v33 = vmul.f32 %v3661_v50, %v1694_v48 }
 0x558   : > { %v4387_v51 = vadd.f32 %v3659_v44, %v1695_v33 }
 0x55a   : > { %v1698_v55 = vcombine.high %v4387_v51, %v4387_v51  ;;  %v1705_v56 = vrot.slane %v4387_v51, %v4141_v4  ;;  %1831 = vmatmul.mubr.f32.vlgmr.msra.gmra.mrb[10].mxu0 %v4387_v51  ;;  %3024 = vmatmul.mubr.f32.vlgmr.msra.gmra.mrb[18].mxu1 %v4387_v51 }
 0x55b   : > { %3443 = vmatpush1.bf16.msra.mxu0 %v3828_v16  ;;  %3474 = vmatpush3.bf16.msra.mxu1 %v3900_v41 }
 0x55c   : > { %v1712_v61 = vrot.slane %v1698_v55, %v4141_v4  ;;  %v1713_v40 = vcombine.high %v1705_v56, %v1705_v56  ;;  %v1721_v59 = vrot.slane %v1705_v56, %v4141_v4  ;;  %2628 = vst.sshfl [vmem:[%s3788_s14 + $0x4] sm:$0x1 pattern:$0x73625140] %v1705_v56  ;;  %3445 = vmatprep.subr.bf16.mxu0 %v3831_v17 }
 0x55d   : > { %3475 = vmatprep.subr.bf16.mxu1 %v3718_v49  ;;  %2061 = vmatprep.mubr.f32.mxu0 %v3717_v6 }
 0x55e   : > { %3058 = vmatprep.mubr.msk.f32.mxu1 %vm3719_vm1, %v3717_v6  ;;  %v1714_v63 = vcombine.high %v1712_v61, %v1712_v61  ;;  %v1728_v1 = vrot.slane %v1712_v61, %v4141_v4  ;;  %v1735_v5 = vrot.slane %v1713_v40, %v4141_v4  ;;  %v1743_v42 = vcombine.high %v1721_v59, %v1721_v59 }
 0x55f   : > { %2629 = vst.sshfl [vmem:[%s3788_s14 + $0xc] sm:$0x1 pattern:$0x73625140] %v1713_v40  ;;  %3447 = vmatpush1.bf16.msra.mxu0 %v3849_v23  ;;  %3477 = vmatpush3.bf16.msra.mxu1 %v3932_v52 }
 0x560   : > { %2630 = vst.sshfl [vmem:[%s3788_s14 + $0x24] sm:$0x1 pattern:$0x73625140] %v1712_v61  ;;  %v1742_v47 = vrot.slane %v1714_v63, %v4141_v4  ;;  %v1744_v28 = vcombine.high %v1728_v1, %v1728_v1  ;;  %v1745_v38 = vcombine.high %v1735_v5, %v1735_v5  ;;  %1757 = vst [vmem:[%s3788_s14 + $0x14] sm:$0x1] %v1743_v42  ;;  %3449 = vmatprep.subr.bf16.mxu0 %v3852_v24 }
 0x561   : > { %2631 = vst.sshfl [vmem:[%s3788_s14 + $0x2c] sm:$0x1 pattern:$0x73625140] %v1714_v63  ;;  %3478 = vmatprep.subr.bf16.mxu1 %v3718_v49 }
 0x562   : > { %v1746_v8 = vcombine.high %v1742_v47, %v1742_v47  ;;  %1758 = vst [vmem:[%s3788_s14 + $0x1c] sm:$0x1] %v1745_v38  ;;  %1761 = vst [vmem:[%s3788_s14 + $0x34] sm:$0x1] %v1744_v28 }
 0x563   : > { %3451 = vmatpush1.bf16.msra.mxu0 %v3876_v32  ;;  %3480 = vmatpush3.bf16.msra.mxu1 %v3964_v62 }
 0x564   : > { %1762 = vst [vmem:[%s3788_s14 + $0x3c] sm:$0x1] %v1746_v8  ;;  %3453 = vmatprep.subr.bf16.mxu0 %v3879_v34  ;;  %3481 = vmatprep.subr.bf16.mxu1 %v3718_v49 }
 0x567   : > { %3455 = vmatpush1.bf16.msra.mxu0 %v3905_v43  ;;  %3483 = vmatpush3.bf16.msra.mxu1 %v3996_v9 }
 0x568   : > { %3457 = vmatprep.subr.bf16.mxu0 %v3914_v46  ;;  %3484 = vmatprep.subr.bf16.mxu1 %v3718_v49 }
 0x56b   : > { %3459 = vmatpush1.bf16.msra.mxu0 %v3937_v54  ;;  %3486 = vmatpush3.bf16.msra.mxu1 %v4022_v20 }
 0x56c   : > { %3461 = vmatprep.subr.bf16.mxu0 %v3946_v57  ;;  %3487 = vmatprep.subr.bf16.mxu1 %v3718_v49 }
 0x56f   : > { %3463 = vmatpush1.bf16.msra.mxu0 %v3969_v0  ;;  %3489 = vmatpush3.bf16.msra.mxu1 %v4040_v27 }
 0x570   : > { %3465 = vmatprep.subr.bf16.mxu0 %v3978_v3  ;;  %3490 = vmatprep.subr.bf16.mxu1 %v3718_v49 }
 0x573   : > { %3467 = vmatpush1.bf16.msra.mxu0 %v4001_v11  ;;  %3492 = vmatpush3.bf16.msra.mxu1 %v4058_v31 }
 0x574   : > { %3469 = vmatprep.subr.bf16.mxu0 %v4010_v15  ;;  %3493 = vmatprep.subr.bf16.mxu1 %v3718_v49 }
 0x577   : > { %3471 = vmatpush1.bf16.msra.mxu0 %v4027_v22  ;;  %3495 = vmatpush3.bf16.msra.mxu1 %v4073_v36 }
 0x578   : > { %3497 = vmatprep.subr.bf16.mxu0 %v3820_v13  ;;  %3528 = vmatprep.subr.bf16.mxu1 %v3718_v49 }
 0x62d   : > { %v1832_v12 = vpop.f32.mrb[10].mxu0  ;;  %v1903_v18 = vpop.f32.mrb[18].mxu1 }
 0x62e   : > { %v3562_v21 = vadd.f32 %v1832_v12, %v4122_v60  ;;  %v1834_v25 = vpop.f32.mrb[11].mxu0  ;;  %v3025_v45 = vpop.f32.mrb[19].mxu1  ;;  %v1921_v13 = vadd.f32 %v4137_v30, %v1903_v18 }
 0x62f   : > { %v3563_v26 = vadd.f32 %v1834_v25, %v4131_v14 }
 0x630   : > { %v2632_v7 = vmul.f32 -1.442695, %v3562_v21 }
 0x631   : > { %v2633_v29 = vmul.f32 -1.442695, %v3563_v26 }
 0x632   : > { %3662 = vpow2.f32 %v2632_v7 }
 0x633   : > { %3664 = vpow2.f32 %v2633_v29 }
 0x63c   : > { %v3663_v35 = vpop.eup %3662 }
 0x63d   : > { %v1911_v37 = vadd.f32 1.0, %v3663_v35  ;;  %v3665_v53 = vpop.eup %3664 }
 0x63e   : > { %v1918_v48 = vadd.f32 1.0, %v3665_v53 }
 0x63f   : > { %3666 = vrcp.f32 %v1911_v37 }
 0x649   : > { %v3667_v19 = vpop.eup %3666 }
 0x64a   : > { %v1922_v39 = vmul.f32 %v3667_v19, %v1921_v13 }
 0x64c   : > { %v1923_v44 = vadd.f32 %v1922_v39, %v4120_v58 }
 0x64e   : > { %3668 = vtanh.f32 %v1923_v44 }
 0x64f   : > { %3670 = vrcp.f32 %v1918_v48 }
 0x658   : > { %v3669_v50 = vpop.eup %3668 }
 0x659   : > { %v1925_v33 = vsub.f32 %v4387_v51, %v3669_v50  ;;  %v3671_v55 = vpop.eup %3670 }
 0x65b   : > { %v1926_v56 = vmul.f32 %v3671_v55, %v1925_v33 }
 0x65d   : > { %v4448_v61 = vadd.f32 %v3669_v50, %v1926_v56  ;;  %v3692_v56 = vld [vmem:[%s4570_s5] ss:$0 sm:$0xff] }
 0x65f   : > { %v1929_v40 = vcombine.high %v4448_v61, %v4448_v61  ;;  %v1936_v59 = vrot.slane %v4448_v61, %v4141_v4  ;;  %2062 = vmatmul.mubr.f32.vlgmr.msra.gmra.mrb[12].mxu0 %v4448_v61  ;;  %3059 = vmatmul.mubr.f32.vlgmr.msra.gmra.mrb[20].mxu1 %v4448_v61 }
 0x660   : > { %3499 = vmatpush1.bf16.msra.mxu0 %v3828_v16  ;;  %3530 = vmatpush3.bf16.msra.mxu1 %v3900_v41 }
 0x661   : > { %v1943_v58 = vrot.slane %v1929_v40, %v4141_v4  ;;  %v1944_v51 = vcombine.high %v1936_v59, %v1936_v59  ;;  %v1952_v63 = vrot.slane %v1936_v59, %v4141_v4  ;;  %2634 = vst.sshfl [vmem:[%s3788_s14 + $0x5] sm:$0x1 pattern:$0x73625140] %v1936_v59  ;;  %3501 = vmatprep.subr.bf16.mxu0 %v3831_v17 }
 0x662   : > { %3531 = vmatprep.subr.bf16.mxu1 %v3718_v49  ;;  %2292 = vmatprep.mubr.f32.mxu0 %v3717_v6 }
 0x663   : > { %3093 = vmatprep.mubr.msk.f32.mxu1 %vm3719_vm1, %v3717_v6  ;;  %v1945_v16 = vcombine.high %v1943_v58, %v1943_v58  ;;  %v1959_v41 = vrot.slane %v1943_v58, %v4141_v4  ;;  %v1966_v1 = vrot.slane %v1944_v51, %v4141_v4  ;;  %v1974_v5 = vcombine.high %v1952_v63, %v1952_v63 }
 0x664   : > { %2635 = vst.sshfl [vmem:[%s3788_s14 + $0xd] sm:$0x1 pattern:$0x73625140] %v1944_v51  ;;  %3503 = vmatpush1.bf16.msra.mxu0 %v3849_v23  ;;  %3533 = vmatpush3.bf16.msra.mxu1 %v3932_v52 }
 0x665   : > { %2636 = vst.sshfl [vmem:[%s3788_s14 + $0x25] sm:$0x1 pattern:$0x73625140] %v1943_v58  ;;  %v1973_v17 = vrot.slane %v1945_v16, %v4141_v4  ;;  %v1975_v42 = vcombine.high %v1959_v41, %v1959_v41  ;;  %v1976_v47 = vcombine.high %v1966_v1, %v1966_v1  ;;  %1988 = vst [vmem:[%s3788_s14 + $0x15] sm:$0x1] %v1974_v5  ;;  %3505 = vmatprep.subr.bf16.mxu0 %v3852_v24 }
 0x666   : > { %2637 = vst.sshfl [vmem:[%s3788_s14 + $0x2d] sm:$0x1 pattern:$0x73625140] %v1945_v16  ;;  %3534 = vmatprep.subr.bf16.mxu1 %v3718_v49 }
 0x667   : > { %v1977_v6 = vcombine.high %v1973_v17, %v1973_v17  ;;  %1989 = vst [vmem:[%s3788_s14 + $0x1d] sm:$0x1] %v1976_v47  ;;  %1992 = vst [vmem:[%s3788_s14 + $0x35] sm:$0x1] %v1975_v42 }
 0x668   : > { %3507 = vmatpush1.bf16.msra.mxu0 %v3876_v32  ;;  %3536 = vmatpush3.bf16.msra.mxu1 %v3964_v62 }
 0x669   : > { %1993 = vst [vmem:[%s3788_s14 + $0x3d] sm:$0x1] %v1977_v6  ;;  %3509 = vmatprep.subr.bf16.mxu0 %v3879_v34  ;;  %3537 = vmatprep.subr.bf16.mxu1 %v3718_v49 }
 0x66c   : > { %3511 = vmatpush1.bf16.msra.mxu0 %v3905_v43  ;;  %3539 = vmatpush3.bf16.msra.mxu1 %v3996_v9 }
 0x66d   : > { %3513 = vmatprep.subr.bf16.mxu0 %v3914_v46  ;;  %3540 = vmatprep.subr.bf16.mxu1 %v3718_v49 }
 0x670   : > { %3515 = vmatpush1.bf16.msra.mxu0 %v3937_v54  ;;  %3542 = vmatpush3.bf16.msra.mxu1 %v4022_v20 }
 0x671   : > { %3517 = vmatprep.subr.bf16.mxu0 %v3946_v57  ;;  %3543 = vmatprep.subr.bf16.mxu1 %v3718_v49 }
 0x674   : > { %3519 = vmatpush1.bf16.msra.mxu0 %v3969_v0  ;;  %3545 = vmatpush3.bf16.msra.mxu1 %v4040_v27 }
 0x675   : > { %3521 = vmatprep.subr.bf16.mxu0 %v3978_v3  ;;  %3546 = vmatprep.subr.bf16.mxu1 %v3718_v49 }
 0x678   : > { %3523 = vmatpush1.bf16.msra.mxu0 %v4001_v11  ;;  %3548 = vmatpush3.bf16.msra.mxu1 %v4058_v31 }
 0x679   : > { %3525 = vmatprep.subr.bf16.mxu0 %v4010_v15  ;;  %3549 = vmatprep.subr.bf16.mxu1 %v3718_v49 }
 0x67c   : > { %3527 = vmatpush1.bf16.msra.mxu0 %v4027_v22  ;;  %3551 = vmatpush3.bf16.msra.mxu1 %v4073_v36 }
 0x732   : > { %v2063_v23 = vpop.f32.mrb[12].mxu0  ;;  %v2134_v24 = vpop.f32.mrb[20].mxu1 }
 0x733   : > { %v3564_v32 = vadd.f32 %v2063_v23, %v4122_v60  ;;  %v2065_v34 = vpop.f32.mrb[13].mxu0  ;;  %v3060_v43 = vpop.f32.mrb[21].mxu1  ;;  %v2152_v0 = vadd.f32 %v4137_v30, %v2134_v24 }
 0x734   : > { %v3565_v52 = vadd.f32 %v2065_v34, %v4131_v14 }
 0x735   : > { %v2638_v46 = vmul.f32 -1.442695, %v3564_v32 }
 0x736   : > { %v2639_v54 = vmul.f32 -1.442695, %v3565_v52 }
 0x737   : > { %3672 = vpow2.f32 %v2638_v46 }
 0x738   : > { %3674 = vpow2.f32 %v2639_v54 }
 0x741   : > { %v3673_v57 = vpop.eup %3672 }
 0x742   : > { %v2142_v62 = vadd.f32 1.0, %v3673_v57  ;;  %v3675_v49 = vpop.eup %3674 }
 0x743   : > { %v2149_v15 = vadd.f32 1.0, %v3675_v49 }
 0x744   : > { %3676 = vrcp.f32 %v2142_v62 }
 0x74e   : > { %v3677_v3 = vpop.eup %3676 }
 0x74f   : > { %v2153_v9 = vmul.f32 %v3677_v3, %v2152_v0 }
 0x751   : > { %v2154_v11 = vadd.f32 %v2153_v9, %v4129_v10 }
 0x753   : > { %3678 = vtanh.f32 %v2154_v11 }
 0x754   : > { %3680 = vrcp.f32 %v2149_v15 }
 0x75d   : > { %v3679_v20 = vpop.eup %3678 }
 0x75e   : > { %v2156_v22 = vsub.f32 %v4448_v61, %v3679_v20  ;;  %v3681_v27 = vpop.eup %3680 }
 0x760   : > { %v2157_v31 = vmul.f32 %v3681_v27, %v2156_v22 }
 0x762   : > { %v2158_v36 = vadd.f32 %v3679_v20, %v2157_v31 }
 0x764   : > { %v2160_v28 = vcombine.high %v2158_v36, %v2158_v36  ;;  %v2167_v38 = vrot.slane %v2158_v36, %v4141_v4  ;;  %2293 = vmatmul.mubr.f32.vlgmr.msra.gmra.mrb[14].mxu0 %v2158_v36  ;;  %3094 = vmatmul.mubr.f32.vlgmr.msra.gmra.mrb[22].mxu1 %v2158_v36 }
 0x766   : > { %v2174_v10 = vrot.slane %v2160_v28, %v4141_v4  ;;  %v2175_v30 = vcombine.high %v2167_v38, %v2167_v38  ;;  %v2183_v8 = vrot.slane %v2167_v38, %v4141_v4  ;;  %2640 = vst.sshfl [vmem:[%s3788_s14 + $0x6] sm:$0x1 pattern:$0x73625140] %v2167_v38 }
 0x768   : > { %v2176_v12 = vcombine.high %v2174_v10, %v2174_v10  ;;  %v2190_v18 = vrot.slane %v2174_v10, %v4141_v4  ;;  %v2197_v21 = vrot.slane %v2175_v30, %v4141_v4  ;;  %v2205_v25 = vcombine.high %v2183_v8, %v2183_v8  ;;  %2641 = vst.sshfl [vmem:[%s3788_s14 + $0xe] sm:$0x1 pattern:$0x73625140] %v2175_v30 }
 0x769   : > { %2642 = vst.sshfl [vmem:[%s3788_s14 + $0x26] sm:$0x1 pattern:$0x73625140] %v2174_v10 }
 0x76a   : > { %v2204_v45 = vrot.slane %v2176_v12, %v4141_v4  ;;  %v2206_v7 = vcombine.high %v2190_v18, %v2190_v18  ;;  %v2207_v26 = vcombine.high %v2197_v21, %v2197_v21  ;;  %2219 = vst [vmem:[%s3788_s14 + $0x16] sm:$0x1] %v2205_v25  ;;  %2643 = vst.sshfl [vmem:[%s3788_s14 + $0x2e] sm:$0x1 pattern:$0x73625140] %v2176_v12 }
 0x76c   : > { %v2208_v29 = vcombine.high %v2204_v45, %v2204_v45  ;;  %2220 = vst [vmem:[%s3788_s14 + $0x1e] sm:$0x1] %v2207_v26  ;;  %2223 = vst [vmem:[%s3788_s14 + $0x36] sm:$0x1] %v2206_v7 }
 0x76e   : > { %2224 = vst [vmem:[%s3788_s14 + $0x3e] sm:$0x1] %v2208_v29 }
 0x837   : > { %v2294_v35 = vpop.f32.mrb[14].mxu0  ;;  %v2365_v37 = vpop.f32.mrb[22].mxu1 }
 0x838   : > { %v3566_v53 = vadd.f32 %v2294_v35, %v4122_v60  ;;  %v2296_v13 = vpop.f32.mrb[15].mxu0  ;;  %v3095_v19 = vpop.f32.mrb[23].mxu1  ;;  %v2383_v61 = vadd.f32 %v3692_v56, %v2365_v37 }
 0x839   : > { %v3567_v44 = vadd.f32 %v2296_v13, %v4131_v14 }
 0x83a   : > { %v2644_v39 = vmul.f32 -1.442695, %v3566_v53 }
 0x83b   : > { %v2645_v48 = vmul.f32 -1.442695, %v3567_v44 }
 0x83c   : > { %3682 = vpow2.f32 %v2644_v39 }
 0x83d   : > { %3684 = vpow2.f32 %v2645_v48 }
 0x846   : > { %v3683_v50 = vpop.eup %3682 }
 0x847   : > { %v2373_v33 = vadd.f32 1.0, %v3683_v50  ;;  %v3685_v55 = vpop.eup %3684 }
 0x848   : > { %v2380_v58 = vadd.f32 1.0, %v3685_v55 }
 0x849   : > { %3686 = vrcp.f32 %v2373_v33 }
 0x853   : > { %v3687_v40 = vpop.eup %3686 }
 0x854   : > { %v2384_v59 = vmul.f32 %v3687_v40, %v2383_v61 }
 0x856   : > { %v2385_v60 = vadd.f32 %v2384_v59, %v4126_v2 }
 0x858   : > { %3688 = vtanh.f32 %v2385_v60 }
 0x859   : > { %3690 = vrcp.f32 %v2380_v58 }
 0x862   : > { %v3689_v14 = vpop.eup %3688 }
 0x863   : > { %v2387_v51 = vsub.f32 %v2158_v36, %v3689_v14  ;;  %v3691_v63 = vpop.eup %3690 }
 0x865   : > { %v2388_v16 = vmul.f32 %v3691_v63, %v2387_v51 }
 0x867   : > { %v2389_v41 = vadd.f32 %v3689_v14, %v2388_v16 }
 0x869   : > { %v2391_v1 = vcombine.high %v2389_v41, %v2389_v41  ;;  %v2398_v5 = vrot.slane %v2389_v41, %v4141_v4  ;;  %2456 = vst [vmem:[#allocation3] sm:$0xff] %v2389_v41 }
 0x86b   : > { %v2405_v17 = vrot.slane %v2391_v1, %v4141_v4  ;;  %v2406_v2 = vcombine.high %v2398_v5, %v2398_v5  ;;  %v2414_v42 = vrot.slane %v2398_v5, %v4141_v4  ;;  %2646 = vst.sshfl [vmem:[%s3788_s14 + $0x7] sm:$0x1 pattern:$0x73625140] %v2398_v5 }
 0x86d   : > { %v2407_v47 = vcombine.high %v2405_v17, %v2405_v17  ;;  %v2421_v6 = vrot.slane %v2405_v17, %v4141_v4  ;;  %v2428_v23 = vrot.slane %v2406_v2, %v4141_v4  ;;  %v2436_v24 = vcombine.high %v2414_v42, %v2414_v42  ;;  %2647 = vst.sshfl [vmem:[%s3788_s14 + $0xf] sm:$0x1 pattern:$0x73625140] %v2406_v2  ;;  %2463 = sbr.rel (!%p3775_p4) target bundleno = 2172 (0x87c), region = 52 }
 0x86e   : > { %2648 = vst.sshfl [vmem:[%s3788_s14 + $0x27] sm:$0x1 pattern:$0x73625140] %v2405_v17 }
 0x86f   : > { %v2435_v32 = vrot.slane %v2407_v47, %v4141_v4  ;;  %v2437_v34 = vcombine.high %v2421_v6, %v2421_v6  ;;  %v2438_v43 = vcombine.high %v2428_v23, %v2428_v23  ;;  %2450 = vst [vmem:[%s3788_s14 + $0x17] sm:$0x1] %v2436_v24  ;;  %2649 = vst.sshfl [vmem:[%s3788_s14 + $0x2f] sm:$0x1 pattern:$0x73625140] %v2407_v47 }
 0x871   : > { %v2439_v46 = vcombine.high %v2435_v32, %v2435_v32  ;;  %2451 = vst [vmem:[%s3788_s14 + $0x1f] sm:$0x1] %v2438_v43  ;;  %2454 = vst [vmem:[%s3788_s14 + $0x37] sm:$0x1] %v2437_v34 }
 0x872   : > { %v2507_v4 = vld [vmem:[%s3788_s14] sm:$0xff] (%p3775_p4) }
 0x873   : > { %2455 = vst [vmem:[%s3788_s14 + $0x3f] sm:$0x1] %v2439_v46  ;;  %2508 = vst [vmem:[%s2465_s11] sm:$0xff] (%p3775_p4), %v2507_v4 }
 0x874   : > { %v2509_v52 = vld [vmem:[%s3788_s14 + $0x8] sm:$0xff] }
 0x875   : > { %2510 = vst [vmem:[%s2465_s11 + $0x10] sm:$0xff] %v2509_v52  ;;  %v2515_v62 = vld [vmem:[%s3788_s14 + $0x20] sm:$0xff] }
 0x876   : > { %v2511_v54 = vld [vmem:[%s3788_s14 + $0x10] sm:$0xff]  ;;  %v2517_v49 = vld [vmem:[%s3788_s14 + $0x28] sm:$0xff]  ;;  %2516 = vst [vmem:[%s2465_s11 + $0x40] sm:$0xff] %v2515_v62 }
 0x877   : > { %2512 = vst [vmem:[%s2465_s11 + $0x20] sm:$0xff] %v2511_v54  ;;  %2518 = vst [vmem:[%s2465_s11 + $0x50] sm:$0xff] %v2517_v49 }
 0x878   : > { %v2513_v57 = vld [vmem:[%s3788_s14 + $0x18] sm:$0xff]  ;;  %v2519_v0 = vld [vmem:[%s3788_s14 + $0x30] sm:$0xff] }
 0x879   : > { %2514 = vst [vmem:[%s2465_s11 + $0x30] sm:$0xff] %v2513_v57  ;;  %2520 = vst [vmem:[%s2465_s11 + $0x60] sm:$0xff] %v2519_v0 }
 0x87a   : > { %v2521_v3 = vld [vmem:[%s3788_s14 + $0x38] sm:$0xff] }
 0x87b   : > { %2522 = vst [vmem:[%s2465_s11 + $0x70] sm:$0xff] %v2521_v3 }
 0x87c PF: > { %p13_p9 = scmp.ge.s32.totalorder %s3767_s25, 4   ;;  %s4573_s21 = smov %s3711_s22 }
 0x87d   : > { %s4574_s22 = smov %s3773_s28  ;;  %s4575_s23 = smov %s3767_s25 }
 0x87e   :  { %15 = sbr.rel (!%p13_p9) target bundleno = 2 (0x2), region = 116 }

</bundles_post_ra>
